<compile_context>
chip_gen: v5e
topology: v5e:2x2
jax: 0.10.0
libtpu: 0.0.40
codegen_flags: <defaults>
</compile_context>

<pallas_src>
import jax
import jax.numpy as jnp
from jax.experimental import pallas as pl
from jax.experimental.pallas import tpu as pltpu

_LANE = 128


def logistic_kernel(x_ref, w_ref, b_ref, o_ref):
    # x_ref: (tbo, 128, F) VMEM   w_ref: (1, 1, F) VMEM
    # b_ref: (1,) SMEM            o_ref: (1, tbo, 128) VMEM
    xw = x_ref[...] * w_ref[...]                   # VPU broadcast multiply
    z = jnp.sum(xw, axis=-1)                       # (tbo, 128) lane reduction (XLU)
    z = z + b_ref[0]                               # scalar bias from SMEM
    denom = 1.0 + jnp.exp(-z)                      # EUP exp
    o_ref[0] = pl.reciprocal(denom, approx=True)   # EUP vrcp -> sigmoid


def _round_up(n, m):
    return (n + m - 1) // m * m


def logistic_forward(x, weight, bias, *, max_tile_rows=1024):
    """sigmoid(x @ weight.T + bias).

    x: (B, F) float32, weight: (1, F) float32 (torch nn.Linear layout),
    bias: (1,) float32. Returns (B, 1) float32.
    """
    B, F = x.shape
    assert weight.shape == (1, F)
    assert bias.shape == (1,)

    # Rows per grid step: multiple of 128, targeting ~4 MiB of x per tile so the
    # pipeline's double buffer (~8 MiB) stays well under the 16 MiB v5e default
    # scoped VMEM (and far under v6e / v7x limits).
    # TODO(synk): for very large F add a feature-axis ("arbitrary") grid dim
    # with a VMEM accumulator instead of loading all of F in one block.
    budget_rows = max(_LANE, (4 * 1024 * 1024) // (F * 4))
    tile_rows = min(max_tile_rows, budget_rows, _round_up(B, _LANE))
    tile_rows = max(_LANE, (tile_rows // _LANE) * _LANE)
    tbo = tile_rows // _LANE
    num_tiles = pl.cdiv(B, tile_rows)
    b_pad = num_tiles * tile_rows

    if b_pad != B:
        x = jnp.pad(x, ((0, b_pad - B), (0, 0)))
    x3 = x.reshape(num_tiles * tbo, _LANE, F)   # free row-major reshape
    w3 = weight.reshape(1, 1, F)
    b1 = bias.reshape(1)

    out3 = pl.pallas_call(
        logistic_kernel,
        out_shape=jax.ShapeDtypeStruct((num_tiles, tbo, _LANE), jnp.float32),
        grid_spec=pltpu.PrefetchScalarGridSpec(
            num_scalar_prefetch=0,
            grid=(num_tiles,),
            in_specs=[
                pl.BlockSpec((tbo, _LANE, F), lambda i: (i, 0, 0)),
                pl.BlockSpec((1, 1, F), lambda i: (0, 0, 0)),       # resident weight row
                pl.BlockSpec(memory_space=pltpu.MemorySpace.SMEM),  # scalar bias
            ],
            out_specs=pl.BlockSpec((1, tbo, _LANE), lambda i: (i, 0, 0)),
        ),
        compiler_params=pltpu.CompilerParams(
            dimension_semantics=("parallel",),
        ),
    )(x3, w3, b1)

    return out3.reshape(b_pad)[:B].reshape(B, 1)


if __name__ == "__main__":
    key = jax.random.PRNGKey(0)
    k_x, k_w, k_b = jax.random.split(key, 3)

    # Small but non-trivial: exercises the multi-tile grid and batch padding.
    batch, in_features = 2000, 64

    bound = 1.0 / (in_features ** 0.5)   # mimic nn.Linear uniform init range
    weight = jax.random.uniform(k_w, (1, in_features), jnp.float32, -bound, bound)
    bias = jax.random.uniform(k_b, (1,), jnp.float32, -bound, bound)
    x = jax.random.normal(k_x, (batch, in_features), jnp.float32)

    y = logistic_forward(x, weight, bias)
    jax.block_until_ready(y)

    # Reference check against plain JAX (approx reciprocal -> slightly loose tol)
    y_ref = jax.nn.sigmoid(x @ weight.T + bias)
    assert y.shape == (batch, 1)
    max_err = float(jnp.max(jnp.abs(y - y_ref)))
    assert jnp.allclose(y, y_ref, atol=2e-3, rtol=2e-3), f"max abs err {max_err}"

    print("KERNEL_OK")
</pallas_src>

<mosaic_0001>
module attributes {stable_mosaic.version = 11 : i64} {
  func.func @logistic_kernel(%arg0: i32, %arg1: memref<8x128x64xf32, #tpu.memory_space<vmem>>, %arg2: memref<1x1x64xf32, #tpu.memory_space<vmem>>, %arg3: memref<1xf32, #tpu.memory_space<smem>>, %arg4: memref<1x8x128xf32, #tpu.memory_space<vmem>>) attributes {dimension_semantics = [#tpu.dimension_semantics<parallel>], iteration_bounds = array<i64: 2>, scalar_prefetch = 0 : i64, scratch_operands = 0 : i64, tpu.core_type = #tpu.core_type<tc>, window_params = [{transform_indices = @transform_0, window_bounds = array<i64: 8, 128, 64>}, {pipeline_mode = #tpu.pipeline_mode<synchronous>, transform_indices = @transform_1, window_bounds = array<i64: 1, 1, 64>}, {transform_indices = @transform_2, window_bounds = array<i64: 1>}, {transform_indices = @transform_3, window_bounds = array<i64: 1, 8, 128>}]} {
    %c0 = arith.constant 0 : index
    %c0_0 = arith.constant 0 : index
    %c0_1 = arith.constant 0 : index
    %0 = vector.load %arg1[%c0, %c0_0, %c0_1] : memref<8x128x64xf32, #tpu.memory_space<vmem>>, vector<8x128x64xf32>
    %c0_2 = arith.constant 0 : index
    %c0_3 = arith.constant 0 : index
    %c0_4 = arith.constant 0 : index
    %1 = vector.load %arg2[%c0_2, %c0_3, %c0_4] : memref<1x1x64xf32, #tpu.memory_space<vmem>>, vector<1x1x64xf32>
    %2 = vector.broadcast %1 : vector<1x1x64xf32> to vector<8x128x64xf32>
    %3 = arith.mulf %0, %2 : vector<8x128x64xf32>
    %cst = arith.constant dense<0.000000e+00> : vector<8x128xf32>
    %4 = vector.multi_reduction <add>, %3, %cst [2] : vector<8x128x64xf32> to vector<8x128xf32>
    %c0_5 = arith.constant 0 : index
    %5 = memref.load %arg3[%c0_5] : memref<1xf32, #tpu.memory_space<smem>>
    %6 = vector.broadcast %5 : f32 to vector<8x128xf32>
    %7 = arith.addf %4, %6 : vector<8x128xf32>
    %cst_6 = arith.constant 0.000000e+00 : f32
    %8 = vector.broadcast %cst_6 : f32 to vector<8x128xf32>
    %9 = arith.subf %8, %7 : vector<8x128xf32>
    %10 = math.exp %9 : vector<8x128xf32>
    %cst_7 = arith.constant 1.000000e+00 : f32
    %11 = vector.broadcast %cst_7 : f32 to vector<8x128xf32>
    %12 = arith.addf %11, %10 : vector<8x128xf32>
    %13 = tpu.reciprocal %12 {approx = true} : vector<8x128xf32> -> vector<8x128xf32>
    %c0_8 = arith.constant 0 : index
    %c0_9 = arith.constant 0 : index
    %c0_10 = arith.constant 0 : index
    %14 = vector.load %arg4[%c0_8, %c0_9, %c0_10] : memref<1x8x128xf32, #tpu.memory_space<vmem>>, vector<1x8x128xf32>
    %15 = vector.shape_cast %14 : vector<1x8x128xf32> to vector<8x128xf32>
    %16 = vector.shape_cast %13 : vector<8x128xf32> to vector<1x8x128xf32>
    tpu.vector_store %arg4[%c0_8, %c0_9, %c0_10], %16 {strides = array<i32>} : memref<1x8x128xf32, #tpu.memory_space<vmem>>, vector<1x8x128xf32>,
    return
  }
  func.func @transform_0(%arg0: i32) -> (i32, i32, i32) {
    %c0_i32 = arith.constant 0 : i32
    %c0_i32_0 = arith.constant 0 : i32
    %c0_i32_1 = arith.constant 0 : i32
    return %arg0, %c0_i32, %c0_i32_0 : i32, i32, i32
  }
  func.func @transform_1(%arg0: i32) -> (i32, i32, i32) {
    %c0_i32 = arith.constant 0 : i32
    %c0_i32_0 = arith.constant 0 : i32
    %c0_i32_1 = arith.constant 0 : i32
    %c0_i32_2 = arith.constant 0 : i32
    return %c0_i32, %c0_i32_0, %c0_i32_1 : i32, i32, i32
  }
  func.func @transform_2(%arg0: i32) -> i32 {
    %c0_i32 = arith.constant 0 : i32
    %c0_i32_0 = arith.constant 0 : i32
    return %c0_i32 : i32
  }
  func.func @transform_3(%arg0: i32) -> (i32, i32, i32) {
    %c0_i32 = arith.constant 0 : i32
    %c0_i32_0 = arith.constant 0 : i32
    %c0_i32_1 = arith.constant 0 : i32
    return %arg0, %c0_i32, %c0_i32_0 : i32, i32, i32
  }
}

</mosaic_0001>

<bundles_post_ra>
// kernel: tpu_custom_call.1
= control target key start
LH: loop header
LB: loop body
LE: loop exit
PB: predicated region body
PF: predicated region fallthrough
CT: control target
= control target key end

     0   :  { %s3750_s0 = inlined_call_operand.vmem [shape: f32[16,128,64], index: 0, kind: input, shape index: {}]   ;;  %s3751_s1 = inlined_call_operand.vmem [shape: f32[1,1,64], index: 1, kind: input, shape index: {}]   ;;  %s3752_s2 = inlined_call_operand.<no memory space> [shape: f32[1], index: 2, kind: input, shape index: {}]   ;;  %s3753_s3 = inlined_call_operand.hbm [shape: f32[2,8,128], index: 3, kind: output, shape index: {}]  }
   0x1   :  { %8 = sst [smem:[#allocation2]] %s3752_s2 }
   0x2   :  { %9 = vsyncpa [#allocation4], 0 }
   0x3   :  { %11 = vsyncpa [#allocation4 + $0x1], 0  ;;  %s2743_s14 = smov 0   ;;  %s2745_s15 = smov 0  }
   0x4   :  { %s2747_s16 = smov 0   ;;  %s2749_s17 = smov 0  }
   0x5 LB: > { %s2088_s2 = sadd.s32 4294967295, %s2718_s17   ;;  %s2089_s18 = sadd.s32 4294967294, %s2718_s17   ;;  %s2718_s17 = sphi %s2749_s17, %s3769_s17   ;;  %s2714_s16 = sphi %s2747_s16, %s3768_s16   ;;  %s2710_s15 = sphi %s2745_s15, %s3767_s15   ;;  %s2706_s14 = sphi %s2743_s14, %s3766_s14  }
   0x6   : > { %s2766_s19 = sadd.s32 1, %s2718_s17   ;;  %s92_s20 = sadd.s32 1, %s2714_s16 }
   0x7   : > { %s89_s21 = ssub.s32 %s2718_s17, %s2766_s19  ;;  %p102_p0 = scmp.ne.s32.totalorder %s2714_s16, %s2710_s15 }
   0x8   : > { %p90_p1 = scmp.eq.s32.totalorder %s89_s21, 0  ;;  %p103_p2 = scmp.eq.s32.totalorder %s2088_s2, 1 }
   0x9   : > { %p108_p3 = scmp.ne.s32.totalorder %s2710_s15, %s2706_s14  ;;  %p109_p4 = scmp.eq.s32.totalorder %s2089_s18, 1 }
   0xa   : > { %s2776_s22 = scalar_select %p90_p1, %s2714_s16, %s92_s20  }
   0xb   : > { %p2778_p5 = por %p103_p2, %p102_p0  ;;  %p2782_p6 = por %p109_p4, %p108_p3 }
   0xc   : > { %p2092_p7 = scmp.ge.s32.totalorder %s2718_s17, 1  ;;  %p143_p8 = scmp.lt.s32.totalorder %s2718_s17, 3 }
   0xe   : > { %p144_p9 = pnand %p2092_p7, %p143_p8 }
   0xf   : > { %s2788_s25 = sshll.u32 (!%p144_p9), %s2088_s2, 3  ;;  %s820_s6 = sld [smem:[#allocation2]] (!%p144_p9) }
  0x10   : > { %147 = sbr.rel (%p144_p9) target bundleno = 513 (0x201), region = 32  ;;  %p169_p10 = scmp.lt.s32.totalorder (!%p144_p9), %s2788_s25, 15 }
  0x11   : > { %s165_s11 = sand.u32 (!%p144_p9), 1, %s2710_s15   ;;  %s2025_s18 = scalar_lea.hbm (!%p144_p9), %s3753_s3, %s2788_s25 }
  0x12   : > { %s2093_s12 = sshll.u32 (!%p144_p9), %s165_s11, 3  ;;  %s2676_s4 = scalar_lea.hbm (!%p144_p9), %s3753_s3, 16 }
  0x13   : > { %s167_s20 = scalar_lea.vmem (!%p144_p9), [#allocation3], %s2093_s12 }
  0x14   : > { %s2027_s21 = sshll.u32 (!%p144_p9), %s167_s20, 4  ;;  %s2028_s21 = int_to_ptr.vmem [resolvable:$true] %s2027_s21 }
  0x15   : > { %s170_s26 = scalar_select %p169_p10, %s2788_s25, 15  ;;  %v2795_v0 = vld [vmem:[%s3751_s1] ss:$0 sm:$0xff]  ;;  %vm435_vm0 = vcmask 523264   ;;  %vm1723_vm1 = vcmask 130112   ;;  %vm1727_vm2 = vcmask 195712  }
  0x16   : > { %vm1731_vm3 = vcmask 261312   ;;  %vm1735_vm4 = vcmask 326912   ;;  %vm1739_vm5 = vcmask 392512   ;;  %vm1743_vm6 = vcmask 458112   ;;  %s2015_s25 = scalar_lea.sflag [#allocation4], %s165_s11 }
  0x17   : > { %s2101_s29 = sshll.u32 %s170_s26, 7  ;;  %vm1747_vm7 = vcmask 523712   ;;  %vm1751_vm8 = vcmask 589312   ;;  %vm1755_vm9 = vcmask 654912   ;;  %vm1759_vm10 = vcmask 720512   ;;  %s2029_s26 = sshll.u32 %s2025_s18, 4  ;;  %s2030_s26 = int_to_ptr.hbm [resolvable:$true] %s2029_s26 }
  0x18   : > { %s2800_s5 = scalar_lea.vmem %s3750_s0, %s2101_s29  ;;  %vm3755_vm11 = vcmask 786112   ;;  %vm3754_vm12 = vcmask 851712   ;;  %vm1771_vm13 = vcmask 917312   ;;  %vm1775_vm14 = vcmask 982912   ;;  %s2670_s27 = sshra.s32 %s2030_s26, 4  ;;  %s2671_s27 = int_to_ptr.hbm [resolvable:$true] %s2670_s27 }
  0x19   : > { %v177_v1 = vld [vmem:[%s2800_s5 + $0x10] sm:$0xff]  ;;  %v175_v2 = vld [vmem:[%s2800_s5] sm:$0xff]  ;;  %v178_v7 = vld [vmem:[%s2800_s5 + $0x18] sm:$0xff]  ;;  %vm1779_vm15 = vcmask 1048512   ;;  %s2672_s28 = scalar_lea.hbm %s2671_s27, 8  ;;  %p2677_p0 = scmp.lt.s32.totalorder %s2671_s27, %s3753_s3 }
  0x1a   : > { %v179_v3 = vld [vmem:[%s2800_s5 + $0x20] sm:$0xff]  ;;  %v309_v4 = vmul.f32 %v2795_v0, %v177_v1  ;;  %v307_v5 = vmul.f32 %v2795_v0, %v175_v2  ;;  %v176_v8 = vld [vmem:[%s2800_s5 + $0x8] sm:$0xff]  ;;  %v310_v13 = vmul.f32 %v2795_v0, %v178_v7  ;;  %v182_v19 = vld [vmem:[%s2800_s5 + $0x38] sm:$0xff]  ;;  %p2673_p11 = scmp.ne.s32.totalorder %s2671_s27, %s2672_s28  ;;  %p2678_p1 = scmp.lt.s32.totalorder %s2676_s4, %s2672_s28 }
  0x1b   : > { %v311_v6 = vmul.f32 %v2795_v0, %v179_v3  ;;  %v180_v12 = vld [vmem:[%s2800_s5 + $0x28] sm:$0xff]  ;;  %v308_v14 = vmul.f32 %v2795_v0, %v176_v8  ;;  %v181_v20 = vld [vmem:[%s2800_s5 + $0x30] sm:$0xff]  ;;  %v183_v21 = vld [vmem:[%s2800_s5 + $0x40] sm:$0xff]  ;;  %v314_v22 = vmul.f32 %v2795_v0, %v182_v19 }
  0x1c   : > { %v442_v9 = vsel %vm435_vm0, %v309_v4, 0.0  ;;  %v436_v10 = vsel %vm435_vm0, %v307_v5, 0.0  ;;  %v312_v15 = vmul.f32 %v2795_v0, %v180_v12  ;;  %v445_v16 = vsel %vm435_vm0, %v310_v13, 0.0  ;;  %v185_v28 = vld [vmem:[%s2800_s5 + $0x50] sm:$0xff]  ;;  %v184_v29 = vld [vmem:[%s2800_s5 + $0x48] sm:$0xff]  ;;  %v186_v30 = vld [vmem:[%s2800_s5 + $0x58] sm:$0xff]  ;;  %p2674_p12 = pnand %p2673_p11, %p2778_p5  ;;  %p2679_p2 = por %p2678_p1, %p2677_p0 }
  0x1d   : > { %v448_v11 = vsel %vm435_vm0, %v311_v6, 0.0  ;;  %443 = vadd.xlane.f32.xlu1 %v442_v9  ;;  %437 = vadd.xlane.f32.xlu0 %v436_v10  ;;  %v439_v17 = vsel %vm435_vm0, %v308_v14, 0.0  ;;  %v313_v23 = vmul.f32 %v2795_v0, %v181_v20  ;;  %v315_v24 = vmul.f32 %v2795_v0, %v183_v21  ;;  %v188_v37 = vld [vmem:[%s2800_s5 + $0x68] sm:$0xff]  ;;  %v187_v38 = vld [vmem:[%s2800_s5 + $0x60] sm:$0xff]  ;;  %v189_v39 = vld [vmem:[%s2800_s5 + $0x70] sm:$0xff] }
  0x1e   : > { %449 = vadd.xlane.f32.xlu2 %v448_v11  ;;  %v451_v18 = vsel %vm435_vm0, %v312_v15, 0.0  ;;  %v457_v25 = vsel %vm435_vm0, %v314_v22, 0.0  ;;  %v317_v31 = vmul.f32 %v2795_v0, %v185_v28  ;;  %v316_v32 = vmul.f32 %v2795_v0, %v184_v29  ;;  %v191_v46 = vld [vmem:[%s2800_s5 + $0x80] sm:$0xff]  ;;  %v190_v47 = vld [vmem:[%s2800_s5 + $0x78] sm:$0xff]  ;;  %v192_v48 = vld [vmem:[%s2800_s5 + $0x88] sm:$0xff]  ;;  %p2675_p13 = pneg %p2674_p12 }
  0x1f   : > { %v454_v26 = vsel %vm435_vm0, %v313_v23, 0.0  ;;  %v460_v27 = vsel %vm435_vm0, %v315_v24, 0.0  ;;  %v318_v33 = vmul.f32 %v2795_v0, %v186_v30  ;;  %v320_v40 = vmul.f32 %v2795_v0, %v188_v37  ;;  %v194_v55 = vld [vmem:[%s2800_s5 + $0x98] sm:$0xff]  ;;  %v193_v56 = vld [vmem:[%s2800_s5 + $0x90] sm:$0xff]  ;;  %v195_v57 = vld [vmem:[%s2800_s5 + $0xa0] sm:$0xff] }
  0x20   : > { %v466_v34 = vsel %vm435_vm0, %v317_v31, 0.0  ;;  %v463_v35 = vsel %vm435_vm0, %v316_v32, 0.0  ;;  %v319_v41 = vmul.f32 %v2795_v0, %v187_v38  ;;  %v321_v42 = vmul.f32 %v2795_v0, %v189_v39  ;;  %v197_v1 = vld [vmem:[%s2800_s5 + $0xb0] sm:$0xff]  ;;  %v196_v2 = vld [vmem:[%s2800_s5 + $0xa8] sm:$0xff]  ;;  %v198_v3 = vld [vmem:[%s2800_s5 + $0xb8] sm:$0xff]  ;;  %p2680_p3 = pnand %p2679_p2, %p2675_p13 }
  0x21   : > { %v469_v36 = vsel %vm435_vm0, %v318_v33, 0.0  ;;  %v475_v43 = vsel %vm435_vm0, %v320_v40, 0.0  ;;  %v323_v49 = vmul.f32 %v2795_v0, %v191_v46  ;;  %v322_v50 = vmul.f32 %v2795_v0, %v190_v47  ;;  %v200_v10 = vld [vmem:[%s2800_s5 + $0xc8] sm:$0xff]  ;;  %v199_v11 = vld [vmem:[%s2800_s5 + $0xc0] sm:$0xff]  ;;  %v201_v12 = vld [vmem:[%s2800_s5 + $0xd0] sm:$0xff] }
  0x22   : > { %v472_v44 = vsel %vm435_vm0, %v319_v41, 0.0  ;;  %v478_v45 = vsel %vm435_vm0, %v321_v42, 0.0  ;;  %v324_v51 = vmul.f32 %v2795_v0, %v192_v48  ;;  %v326_v58 = vmul.f32 %v2795_v0, %v194_v55  ;;  %v203_v19 = vld [vmem:[%s2800_s5 + $0xe0] sm:$0xff]  ;;  %v202_v20 = vld [vmem:[%s2800_s5 + $0xd8] sm:$0xff]  ;;  %v204_v21 = vld [vmem:[%s2800_s5 + $0xe8] sm:$0xff] }
  0x23   : > { %v484_v52 = vsel %vm435_vm0, %v323_v49, 0.0  ;;  %v481_v53 = vsel %vm435_vm0, %v322_v50, 0.0  ;;  %v325_v59 = vmul.f32 %v2795_v0, %v193_v56  ;;  %v327_v60 = vmul.f32 %v2795_v0, %v195_v57  ;;  %v206_v28 = vld [vmem:[%s2800_s5 + $0xf8] sm:$0xff]  ;;  %v205_v29 = vld [vmem:[%s2800_s5 + $0xf0] sm:$0xff]  ;;  %v207_v30 = vld [vmem:[%s2800_s5 + $0x100] sm:$0xff] }
  0x24   : > { %v487_v54 = vsel %vm435_vm0, %v324_v51, 0.0  ;;  %v493_v61 = vsel %vm435_vm0, %v326_v58, 0.0  ;;  %v329_v4 = vmul.f32 %v2795_v0, %v197_v1  ;;  %v328_v5 = vmul.f32 %v2795_v0, %v196_v2  ;;  %v209_v37 = vld [vmem:[%s2800_s5 + $0x110] sm:$0xff]  ;;  %v208_v38 = vld [vmem:[%s2800_s5 + $0x108] sm:$0xff]  ;;  %v210_v39 = vld [vmem:[%s2800_s5 + $0x118] sm:$0xff] }
  0x25   : > { %446 = vadd.xlane.f32.xlu1 %v445_v16  ;;  %440 = vadd.xlane.f32.xlu0 %v439_v17  ;;  %v490_v62 = vsel %vm435_vm0, %v325_v59, 0.0  ;;  %v496_v63 = vsel %vm435_vm0, %v327_v60, 0.0  ;;  %v330_v6 = vmul.f32 %v2795_v0, %v198_v3  ;;  %v332_v13 = vmul.f32 %v2795_v0, %v200_v10  ;;  %v212_v46 = vld [vmem:[%s2800_s5 + $0x128] sm:$0xff]  ;;  %v211_v47 = vld [vmem:[%s2800_s5 + $0x120] sm:$0xff]  ;;  %v213_v48 = vld [vmem:[%s2800_s5 + $0x130] sm:$0xff] }
  0x26   : > { %452 = vadd.xlane.f32.xlu2 %v451_v18  ;;  %v502_v7 = vsel %vm435_vm0, %v329_v4, 0.0  ;;  %v499_v8 = vsel %vm435_vm0, %v328_v5, 0.0  ;;  %v331_v14 = vmul.f32 %v2795_v0, %v199_v11  ;;  %v333_v15 = vmul.f32 %v2795_v0, %v201_v12  ;;  %v215_v55 = vld [vmem:[%s2800_s5 + $0x140] sm:$0xff]  ;;  %v214_v56 = vld [vmem:[%s2800_s5 + $0x138] sm:$0xff]  ;;  %v216_v57 = vld [vmem:[%s2800_s5 + $0x148] sm:$0xff] }
  0x27   : > { %v505_v9 = vsel %vm435_vm0, %v330_v6, 0.0  ;;  %v511_v16 = vsel %vm435_vm0, %v332_v13, 0.0  ;;  %v335_v22 = vmul.f32 %v2795_v0, %v203_v19  ;;  %v334_v23 = vmul.f32 %v2795_v0, %v202_v20  ;;  %v218_v1 = vld [vmem:[%s2800_s5 + $0x158] sm:$0xff]  ;;  %v217_v2 = vld [vmem:[%s2800_s5 + $0x150] sm:$0xff]  ;;  %v219_v3 = vld [vmem:[%s2800_s5 + $0x160] sm:$0xff] }
  0x28   : > { %v508_v17 = vsel %vm435_vm0, %v331_v14, 0.0  ;;  %v514_v18 = vsel %vm435_vm0, %v333_v15, 0.0  ;;  %v336_v24 = vmul.f32 %v2795_v0, %v204_v21  ;;  %v338_v31 = vmul.f32 %v2795_v0, %v206_v28  ;;  %v221_v10 = vld [vmem:[%s2800_s5 + $0x170] sm:$0xff]  ;;  %v220_v11 = vld [vmem:[%s2800_s5 + $0x168] sm:$0xff]  ;;  %v222_v12 = vld [vmem:[%s2800_s5 + $0x178] sm:$0xff] }
  0x29   : > { %v337_v32 = vmul.f32 %v2795_v0, %v205_v29  ;;  %v339_v33 = vmul.f32 %v2795_v0, %v207_v30  ;;  %v341_v40 = vmul.f32 %v2795_v0, %v209_v37  ;;  %v340_v41 = vmul.f32 %v2795_v0, %v208_v38  ;;  %v224_v28 = vld [vmem:[%s2800_s5 + $0x188] sm:$0xff]  ;;  %v223_v29 = vld [vmem:[%s2800_s5 + $0x180] sm:$0xff]  ;;  %v225_v30 = vld [vmem:[%s2800_s5 + $0x190] sm:$0xff] }
  0x2a   : > { %v342_v42 = vmul.f32 %v2795_v0, %v210_v39  ;;  %v344_v49 = vmul.f32 %v2795_v0, %v212_v46  ;;  %v343_v50 = vmul.f32 %v2795_v0, %v211_v47  ;;  %v345_v51 = vmul.f32 %v2795_v0, %v213_v48 }
  0x2b   : > { %v347_v58 = vmul.f32 %v2795_v0, %v215_v55  ;;  %v346_v59 = vmul.f32 %v2795_v0, %v214_v56  ;;  %v348_v60 = vmul.f32 %v2795_v0, %v216_v57  ;;  %v350_v4 = vmul.f32 %v2795_v0, %v218_v1  ;;  %v230_v55 = vld [vmem:[%s2800_s5 + $0x1b8] sm:$0xff] }
  0x2c   : > { %v349_v5 = vmul.f32 %v2795_v0, %v217_v2  ;;  %v351_v6 = vmul.f32 %v2795_v0, %v219_v3  ;;  %v2940_v13 = vstv %s820_s6  ;;  %v353_v14 = vmul.f32 %v2795_v0, %v221_v10 }
  0x2d   : > { %458 = vadd.xlane.f32.xlu1 %v457_v25  ;;  %455 = vadd.xlane.f32.xlu0 %v454_v26  ;;  %v520_v25 = vsel %vm435_vm0, %v335_v22, 0.0  ;;  %v517_v26 = vsel %vm435_vm0, %v334_v23, 0.0  ;;  %v352_v15 = vmul.f32 %v2795_v0, %v220_v11  ;;  %v357_v37 = vmul.f32 %v2795_v0, %v225_v30 }
  0x2e   : > { %461 = vadd.xlane.f32.xlu2 %v460_v27  ;;  %v523_v27 = vsel %vm435_vm0, %v336_v24, 0.0  ;;  %v574_v23 = vsel %vm435_vm0, %v353_v14, 0.0  ;;  %v362_v2 = vmul.f32 %v2795_v0, %v230_v55 }
  0x2f   : > { %v571_v24 = vsel %vm435_vm0, %v352_v15, 0.0 }
  0x35   : > { %467 = vadd.xlane.f32.xlu1 %v466_v34  ;;  %464 = vadd.xlane.f32.xlu0 %v463_v35  ;;  %v529_v34 = vsel %vm435_vm0, %v338_v31, 0.0  ;;  %v526_v35 = vsel %vm435_vm0, %v337_v32, 0.0  ;;  %v1718_v31 = vlaneseq }
  0x36   : > { %470 = vadd.xlane.f32.xlu2 %v469_v36  ;;  %v532_v36 = vsel %vm435_vm0, %v339_v33, 0.0 }
  0x3d   : > { %476 = vadd.xlane.f32.xlu1 %v475_v43  ;;  %473 = vadd.xlane.f32.xlu0 %v472_v44  ;;  %v538_v43 = vsel %vm435_vm0, %v341_v40, 0.0  ;;  %v535_v44 = vsel %vm435_vm0, %v340_v41, 0.0  ;;  %v227_v40 = vld [vmem:[%s2800_s5 + $0x1a0] sm:$0xff]  ;;  %v2958_v41 = vand.u32 127, %v1718_v31 }
  0x3e   : > { %479 = vadd.xlane.f32.xlu2 %v478_v45  ;;  %v541_v45 = vsel %vm435_vm0, %v342_v42, 0.0 }
  0x3f   : > { %v2978_v1 = vadd.s32 4294967264, %v2958_v41 }
  0x45   : > { %485 = vadd.xlane.f32.xlu1 %v484_v52  ;;  %482 = vadd.xlane.f32.xlu0 %v481_v53  ;;  %v547_v52 = vsel %vm435_vm0, %v344_v49, 0.0  ;;  %v544_v53 = vsel %vm435_vm0, %v343_v50, 0.0  ;;  %v228_v50 = vld [vmem:[%s2800_s5 + $0x1a8] sm:$0xff] }
  0x46   : > { %488 = vadd.xlane.f32.xlu2 %v487_v54  ;;  %v550_v54 = vsel %vm435_vm0, %v345_v51, 0.0 }
  0x4d   : > { %494 = vadd.xlane.f32.xlu1 %v493_v61  ;;  %491 = vadd.xlane.f32.xlu0 %v490_v62  ;;  %v556_v61 = vsel %vm435_vm0, %v347_v58, 0.0  ;;  %v553_v62 = vsel %vm435_vm0, %v346_v59, 0.0  ;;  %v229_v58 = vld [vmem:[%s2800_s5 + $0x1b0] sm:$0xff] }
  0x4e   : > { %497 = vadd.xlane.f32.xlu2 %v496_v63  ;;  %v559_v63 = vsel %vm435_vm0, %v348_v60, 0.0  ;;  %v360_v60 = vmul.f32 %v2795_v0, %v228_v50 }
  0x55   : > { %503 = vadd.xlane.f32.xlu1 %v502_v7  ;;  %500 = vadd.xlane.f32.xlu0 %v499_v8  ;;  %v565_v7 = vsel %vm435_vm0, %v350_v4, 0.0  ;;  %v562_v8 = vsel %vm435_vm0, %v349_v5, 0.0 }
  0x56   : > { %506 = vadd.xlane.f32.xlu2 %v505_v9  ;;  %v568_v9 = vsel %vm435_vm0, %v351_v6, 0.0  ;;  %v361_v6 = vmul.f32 %v2795_v0, %v229_v58 }
  0x5d   : > { %512 = vadd.xlane.f32.xlu1 %v511_v16  ;;  %509 = vadd.xlane.f32.xlu0 %v508_v17  ;;  %v354_v16 = vmul.f32 %v2795_v0, %v222_v12 }
  0x5e   : > { %515 = vadd.xlane.f32.xlu2 %v514_v18 }
  0x65   : > { %521 = vadd.xlane.f32.xlu1 %v520_v25  ;;  %518 = vadd.xlane.f32.xlu0 %v517_v26 }
  0x66   : > { %524 = vadd.xlane.f32.xlu2 %v523_v27  ;;  %v577_v27 = vsel %vm435_vm0, %v354_v16, 0.0 }
  0x6d   : > { %530 = vadd.xlane.f32.xlu1 %v529_v34  ;;  %527 = vadd.xlane.f32.xlu0 %v526_v35  ;;  %v356_v35 = vmul.f32 %v2795_v0, %v224_v28 }
  0x6e   : > { %533 = vadd.xlane.f32.xlu2 %v532_v36  ;;  %v355_v36 = vmul.f32 %v2795_v0, %v223_v29 }
  0x6f   : > { %v583_v48 = vsel %vm435_vm0, %v356_v35, 0.0 }
  0x70   : > { %v580_v49 = vsel %vm435_vm0, %v355_v36, 0.0 }
  0x75   : > { %539 = vadd.xlane.f32.xlu1 %v538_v43  ;;  %536 = vadd.xlane.f32.xlu0 %v535_v44 }
  0x76   : > { %542 = vadd.xlane.f32.xlu2 %v541_v45  ;;  %v226_v45 = vld [vmem:[%s2800_s5 + $0x198] sm:$0xff] }
  0x77   : > { %v358_v57 = vmul.f32 %v2795_v0, %v226_v45 }
  0x79   : > { %v589_v11 = vsel %vm435_vm0, %v358_v57, 0.0 }
  0x7d   : > { %548 = vadd.xlane.f32.xlu1 %v547_v52  ;;  %545 = vadd.xlane.f32.xlu0 %v544_v53  ;;  %v586_v53 = vsel %vm435_vm0, %v357_v37, 0.0  ;;  %v236_v37 = vld [vmem:[%s2800_s5 + $0x1e8] sm:$0xff] }
  0x7e   : > { %551 = vadd.xlane.f32.xlu2 %v550_v54  ;;  %v359_v54 = vmul.f32 %v2795_v0, %v227_v40 }
  0x80   : > { %v592_v5 = vsel %vm435_vm0, %v359_v54, 0.0 }
  0x85   : > { %557 = vadd.xlane.f32.xlu1 %v556_v61  ;;  %554 = vadd.xlane.f32.xlu0 %v553_v62  ;;  %v231_v61 = vld [vmem:[%s2800_s5 + $0x1c0] sm:$0xff] }
  0x86   : > { %560 = vadd.xlane.f32.xlu2 %v559_v63  ;;  %v2975_v63 = vadd.s32 4294967280, %v2958_v41  ;;  %v363_v12 = vmul.f32 %v2795_v0, %v231_v61 }
  0x88   : > { %v3002_v30 = vsel %vm435_vm0, %v363_v12, 0.0 }
  0x8d   : > { %566 = vadd.xlane.f32.xlu1 %v565_v7  ;;  %563 = vadd.xlane.f32.xlu0 %v562_v8  ;;  %v2984_v7 = vadd.s32 4294967272, %v2958_v41 }
  0x8e   : > { %569 = vadd.xlane.f32.xlu2 %v568_v9 }
  0x90   : > { %v444_v17 = vpop.xlane.xlu1 %443  ;;  %v438_v18 = vpop.xlane.xlu0 %437 }
  0x91   : > { %v824_v19 = vadd.f32 %v2940_v13, %v444_v17  ;;  %v822_v20 = vadd.f32 %v2940_v13, %v438_v18  ;;  %v450_v21 = vpop.xlane.xlu2 %449  ;;  %v595_v18 = vsel %vm435_vm0, %v360_v60, 0.0 }
  0x92   : > { %v826_v22 = vadd.f32 %v2940_v13, %v450_v21  ;;  %v2993_v21 = vadd.s32 4294967288, %v2958_v41 }
  0x93   : > { %v952_v25 = vsub.f32 0.0, %v824_v19  ;;  %v950_v26 = vsub.f32 0.0, %v822_v20  ;;  %v233_v19 = vld [vmem:[%s2800_s5 + $0x1d0] sm:$0xff] }
  0x94   : > { %v954_v34 = vsub.f32 0.0, %v826_v22  ;;  %v365_v31 = vmul.f32 %v2795_v0, %v233_v19 }
  0x95   : > { %v1082_v32 = vmul.f32 1.442695, %v952_v25  ;;  %v1078_v33 = vmul.f32 1.442695, %v950_v26  ;;  %575 = vadd.xlane.f32.xlu1 %v574_v23  ;;  %572 = vadd.xlane.f32.xlu0 %v571_v24  ;;  %v2997_v23 = vsel %vm435_vm0, %v362_v2, 0.0  ;;  %v598_v26 = vsel %vm435_vm0, %v361_v6, 0.0 }
  0x96   : > { %578 = vadd.xlane.f32.xlu2 %v577_v27  ;;  %v1086_v46 = vmul.f32 1.442695, %v954_v34  ;;  %v232_v27 = vld [vmem:[%s2800_s5 + $0x1c8] sm:$0xff]  ;;  %v3007_v34 = vadd.s32 4294967256, %v2958_v41  ;;  %v3021_v50 = vsel %vm435_vm0, %v365_v31, 0.0 }
  0x97   : > { %2142 = vpow2.f32 %v1082_v32  ;;  %v234_v32 = vld [vmem:[%s2800_s5 + $0x1d8] sm:$0xff]  ;;  %v364_v40 = vmul.f32 %v2795_v0, %v232_v27  ;;  %v3057_v27 = vadd.s32 4294967192, %v2958_v41 }
  0x98   : > { %v447_v38 = vpop.xlane.xlu1 %446  ;;  %v441_v39 = vpop.xlane.xlu0 %440  ;;  %2144 = vpow2.f32 %v1078_v33  ;;  %v366_v45 = vmul.f32 %v2795_v0, %v234_v32 }
  0x99   : > { %v825_v42 = vadd.f32 %v2940_v13, %v447_v38  ;;  %v823_v43 = vadd.f32 %v2940_v13, %v441_v39  ;;  %v453_v44 = vpop.xlane.xlu2 %452  ;;  %2146 = vpow2.f32 %v1086_v46  ;;  %v237_v46 = vld [vmem:[%s2800_s5 + $0x1f0] sm:$0xff] }
  0x9a   : > { %v827_v47 = vadd.f32 %v2940_v13, %v453_v44  ;;  %v3013_v44 = vadd.s32 4294967240, %v2958_v41  ;;  %v369_v60 = vmul.f32 %v2795_v0, %v237_v46  ;;  %v613_v12 = vsel %vm435_vm0, %v366_v45, 0.0 }
  0x9b   : > { %v953_v51 = vsub.f32 0.0, %v825_v42  ;;  %v951_v52 = vsub.f32 0.0, %v823_v43  ;;  %v235_v42 = vld [vmem:[%s2800_s5 + $0x1e0] sm:$0xff] }
  0x9c   : > { %v955_v56 = vsub.f32 0.0, %v827_v47  ;;  %v3018_v47 = vadd.s32 4294967248, %v2958_v41 }
  0x9d   : > { %v1084_v59 = vmul.f32 1.442695, %v953_v51  ;;  %584 = vadd.xlane.f32.xlu1 %v583_v48  ;;  %581 = vadd.xlane.f32.xlu0 %v580_v49  ;;  %v2143_v62 = vpop.eup %2142  ;;  %v1080_v4 = vmul.f32 1.442695, %v951_v52  ;;  %v368_v51 = vmul.f32 %v2795_v0, %v236_v37 }
  0x9e   : > { %587 = vadd.xlane.f32.xlu2 %v586_v53  ;;  %v2145_v3 = vpop.eup %2144  ;;  %v1088_v8 = vmul.f32 1.442695, %v955_v56  ;;  %v1336_v14 = vadd.f32 1.0, %v2143_v62  ;;  %v367_v56 = vmul.f32 %v2795_v0, %v235_v42 }
  0x9f   : > { %2148 = vpow2.f32 %v1084_v59  ;;  %v1334_v20 = vadd.f32 1.0, %v2145_v3  ;;  %v2147_v28 = vpop.eup %2146 }
  0xa0   : > { %v459_v9 = vpop.xlane.xlu1 %458  ;;  %v456_v10 = vpop.xlane.xlu0 %455  ;;  %2150 = vpow2.f32 %v1080_v4  ;;  %v1338_v43 = vadd.f32 1.0, %v2147_v28 }
  0xa1   : > { %v829_v15 = vadd.f32 %v2940_v13, %v459_v9  ;;  %v828_v16 = vadd.f32 %v2940_v13, %v456_v10  ;;  %v462_v17 = vpop.xlane.xlu2 %461  ;;  %2152 = vpow2.f32 %v1088_v8  ;;  %v607_v8 = vsel %vm435_vm0, %v364_v40, 0.0 }
  0xa2   : > { %v830_v22 = vadd.f32 %v2940_v13, %v462_v17  ;;  %2154 = vrcp.f32 %v1336_v14  ;;  %v3041_v17 = vadd.s32 4294967224, %v2958_v41 }
  0xa3   : > { %v957_v24 = vsub.f32 0.0, %v829_v15  ;;  %v956_v25 = vsub.f32 0.0, %v828_v16  ;;  %2156 = vrcp.f32 %v1334_v20  ;;  %v3038_v16 = vadd.s32 4294967216, %v2958_v41 }
  0xa4   : > { %v958_v29 = vsub.f32 0.0, %v830_v22  ;;  %v3048_v20 = vadd.s32 4294967208, %v2958_v41  ;;  %v3051_v22 = vsel %vm435_vm0, %v367_v56, 0.0 }
  0xa5   : > { %v2149_v33 = vpop.eup %2148  ;;  %v1092_v35 = vmul.f32 1.442695, %v957_v24  ;;  %v1090_v36 = vmul.f32 1.442695, %v956_v25  ;;  %593 = vadd.xlane.f32.xlu1 %v592_v5  ;;  %590 = vadd.xlane.f32.xlu0 %v589_v11  ;;  %v3032_v5 = vadd.s32 4294967232, %v2958_v41 }
  0xa6   : > { %v1337_v38 = vadd.f32 1.0, %v2149_v33  ;;  %v1094_v39 = vmul.f32 1.442695, %v958_v29  ;;  %596 = vadd.xlane.f32.xlu2 %v595_v18  ;;  %v2151_v52 = vpop.eup %2150  ;;  %v3045_v18 = vsel %vm435_vm0, %v368_v51, 0.0 }
  0xa7   : > { %2158 = vpow2.f32 %v1092_v35  ;;  %v2153_v57 = vpop.eup %2152  ;;  %v1335_v58 = vadd.f32 1.0, %v2151_v52  ;;  %v238_v52 = vld [vmem:[%s2800_s5 + $0x1f8] sm:$0xff] }
  0xa8   : > { %2160 = vrcp.f32 %v1337_v38  ;;  %v468_v48 = vpop.xlane.xlu1 %467  ;;  %v465_v49 = vpop.xlane.xlu0 %464  ;;  %v1339_v62 = vadd.f32 1.0, %v2153_v57 }
  0xa9   : > { %2162 = vpow2.f32 %v1090_v36  ;;  %v832_v53 = vadd.f32 %v2940_v13, %v468_v48  ;;  %v831_v54 = vadd.f32 %v2940_v13, %v465_v49  ;;  %v471_v55 = vpop.xlane.xlu2 %470  ;;  %v3029_v61 = vpop.eup %2154  ;;  %v239_v36 = vld [vmem:[%s2800_s5 + $0x200] sm:$0xff] }
  0xaa   : > { %2164 = vpow2.f32 %v1094_v39  ;;  %v833_v59 = vadd.f32 %v2940_v13, %v471_v55  ;;  %v2157_v4 = vpop.eup %2156  ;;  %v1726_v48 = vperm.slane %v3029_v61, %v2975_v63  ;;  %v371_v51 = vmul.f32 %v2795_v0, %v239_v36 }
  0xab   : > { %2166 = vrcp.f32 %v1338_v43  ;;  %v960_v2 = vsub.f32 0.0, %v832_v53  ;;  %v959_v3 = vsub.f32 0.0, %v831_v54  ;;  %v1720_v38 = vperm.slane %v2157_v4, %v2958_v41 }
  0xac   : > { %2168 = vrcp.f32 %v1335_v58  ;;  %v961_v6 = vsub.f32 0.0, %v833_v59 }
  0xad   : > { %v2159_v9 = vpop.eup %2158  ;;  %2170 = vrcp.f32 %v1339_v62  ;;  %v1098_v10 = vmul.f32 1.442695, %v960_v2  ;;  %v1096_v11 = vmul.f32 1.442695, %v959_v3  ;;  %602 = vadd.xlane.f32.xlu1 %v2997_v23  ;;  %599 = vadd.xlane.f32.xlu0 %v598_v26  ;;  %v3054_v23 = vsel %vm435_vm0, %v369_v60, 0.0 }
  0xae   : > { %v2161_v14 = vpop.eup %2160  ;;  %v1341_v15 = vadd.f32 1.0, %v2159_v9  ;;  %605 = vadd.xlane.f32.xlu2 %v3002_v30  ;;  %v1100_v26 = vmul.f32 1.442695, %v961_v6  ;;  %v3076_v62 = vadd.s32 4294967200, %v2958_v41  ;;  %v370_v6 = vmul.f32 %v2795_v0, %v238_v52 }
  0xaf   : > { %v2163_v19 = vpop.eup %2162  ;;  %2172 = vpow2.f32 %v1098_v10  ;;  %v1730_v39 = vperm.slane %v2161_v14, %v2984_v7 }
  0xb0   : > { %v2165_v24 = vpop.eup %2164  ;;  %2174 = vrcp.f32 %v1341_v15  ;;  %v1340_v25 = vadd.f32 1.0, %v2163_v19  ;;  %v477_v28 = vpop.xlane.xlu1 %476 }
  0xb1   : > { %v474_v29 = vpop.xlane.xlu0 %473  ;;  %v2167_v30 = vpop.eup %2166  ;;  %v1342_v31 = vadd.f32 1.0, %v2165_v24  ;;  %2176 = vpow2.f32 %v1096_v11  ;;  %v835_v32 = vadd.f32 %v2940_v13, %v477_v28 }
  0xb2   : > { %v834_v33 = vadd.f32 %v2940_v13, %v474_v29  ;;  %v480_v35 = vpop.xlane.xlu2 %479  ;;  %v2169_v37 = vpop.eup %2168  ;;  %2178 = vrcp.f32 %v1340_v25  ;;  %v1734_v59 = vperm.slane %v2167_v30, %v2978_v1 }
  0xb3   : > { %v836_v40 = vadd.f32 %v2940_v13, %v480_v35  ;;  %v2171_v42 = vpop.eup %2170  ;;  %v1722_v43 = vperm.slane %v2169_v37, %v2993_v21  ;;  %2180 = vrcp.f32 %v1342_v31  ;;  %v963_v45 = vsub.f32 0.0, %v835_v32 }
  0xb4   : > { %v962_v46 = vsub.f32 0.0, %v834_v33  ;;  %2182 = vpow2.f32 %v1100_v26  ;;  %v1738_v55 = vperm.slane %v2171_v42, %v3007_v34  ;;  %v240_v26 = vld [vmem:[%s2800_s5 + $0x208] sm:$0xff]  ;;  %v241_v42 = vld [vmem:[%s2800_s5 + $0x210] sm:$0xff] }
  0xb5   : > { %v964_v49 = vsub.f32 0.0, %v836_v40  ;;  %v2173_v53 = vpop.eup %2172  ;;  %v1724_v54 = vsel %vm1723_vm1, %v1722_v43, %v1720_v38  ;;  %v1104_v56 = vmul.f32 1.442695, %v963_v45  ;;  %611 = vadd.xlane.f32.xlu1 %v3021_v50  ;;  %608 = vadd.xlane.f32.xlu0 %v607_v8  ;;  %v242_v40 = vld [vmem:[%s2800_s5 + $0x218] sm:$0xff] }
  0xb6   : > { %v1102_v57 = vmul.f32 1.442695, %v962_v46  ;;  %v2175_v58 = vpop.eup %2174  ;;  %v1728_v60 = vsel %vm1727_vm2, %v1726_v48, %v1724_v54  ;;  %v1344_v61 = vadd.f32 1.0, %v2173_v53  ;;  %614 = vadd.xlane.f32.xlu2 %v613_v12  ;;  %v628_v48 = vsel %vm435_vm0, %v371_v51, 0.0 }
  0xb7   : > { %v2177_v2 = vpop.eup %2176  ;;  %v1732_v3 = vsel %vm1731_vm3, %v1730_v39, %v1728_v60  ;;  %2184 = vpow2.f32 %v1104_v56  ;;  %v1106_v4 = vmul.f32 1.442695, %v964_v49  ;;  %v1746_v9 = vperm.slane %v2175_v58, %v3013_v44 }
  0xb8   : > { %v2179_v50 = vpop.eup %2178  ;;  %v1736_v8 = vsel %vm1735_vm4, %v1734_v59, %v1732_v3  ;;  %2186 = vrcp.f32 %v1344_v61  ;;  %v1343_v10 = vadd.f32 1.0, %v2177_v2  ;;  %v486_v11 = vpop.xlane.xlu1 %485  ;;  %v372_v39 = vmul.f32 %v2795_v0, %v240_v26 }
  0xb9   : > { %v483_v14 = vpop.xlane.xlu0 %482  ;;  %v2181_v15 = vpop.eup %2180  ;;  %v1740_v12 = vsel %vm1739_vm5, %v1738_v55, %v1736_v8  ;;  %v1742_v19 = vperm.slane %v2179_v50, %v3018_v47  ;;  %2188 = vpow2.f32 %v1102_v57  ;;  %v838_v24 = vadd.f32 %v2940_v13, %v486_v11 }
  0xba   : > { %v489_v25 = vpop.xlane.xlu2 %488  ;;  %v2183_v28 = vpop.eup %2182  ;;  %v1750_v29 = vperm.slane %v2181_v15, %v3032_v5  ;;  %2190 = vrcp.f32 %v1343_v10  ;;  %v837_v30 = vadd.f32 %v2940_v13, %v483_v14  ;;  %v3099_v53 = vadd.s32 4294967184, %v2958_v41 }
  0xbb   : > { %v839_v31 = vadd.f32 %v2940_v13, %v489_v25  ;;  %v1744_v32 = vsel %vm1743_vm6, %v1742_v19, %v1740_v12  ;;  %v1345_v33 = vadd.f32 1.0, %v2183_v28  ;;  %2192 = vpow2.f32 %v1106_v4  ;;  %v245_v28 = vld [vmem:[%s2800_s5 + $0x230] sm:$0xff] }
  0xbc   : > { %v966_v35 = vsub.f32 0.0, %v838_v24  ;;  %v1748_v36 = vsel %vm1747_vm7, %v1746_v9, %v1744_v32  ;;  %v965_v37 = vsub.f32 0.0, %v837_v30  ;;  %v625_v55 = vsel %vm435_vm0, %v370_v6, 0.0  ;;  %v244_v32 = vld [vmem:[%s2800_s5 + $0x228] sm:$0xff] }
  0xbd   : > { %v967_v38 = vsub.f32 0.0, %v839_v31  ;;  %v2185_v43 = vpop.eup %2184  ;;  %v1752_v45 = vsel %vm1751_vm8, %v1750_v29, %v1748_v36  ;;  %2194 = vrcp.f32 %v1345_v33  ;;  %620 = vadd.xlane.f32.xlu1 %v3045_v18  ;;  %617 = vadd.xlane.f32.xlu0 %v3051_v22  ;;  %v374_v58 = vmul.f32 %v2795_v0, %v242_v40  ;;  %v243_v22 = vld [vmem:[%s2800_s5 + $0x220] sm:$0xff] }
  0xbe   : > { %v1110_v46 = vmul.f32 1.442695, %v966_v35  ;;  %v2187_v49 = vpop.eup %2186  ;;  %v1347_v52 = vadd.f32 1.0, %v2185_v43  ;;  %v1108_v54 = vmul.f32 1.442695, %v965_v37  ;;  %623 = vadd.xlane.f32.xlu2 %v3054_v23  ;;  %v373_v18 = vmul.f32 %v2795_v0, %v241_v42 }
  0xbf   : > { %v2189_v56 = vpop.eup %2188  ;;  %v1112_v57 = vmul.f32 1.442695, %v967_v38  ;;  %v1758_v51 = vperm.slane %v2187_v49, %v3038_v16  ;;  %v631_v23 = vsel %vm435_vm0, %v372_v39, 0.0  ;;  %v375_v11 = vmul.f32 %v2795_v0, %v243_v22 }
  0xc0   : > { %2196 = vpow2.f32 %v1110_v46  ;;  %v2191_v59 = vpop.eup %2190  ;;  %v1346_v60 = vadd.f32 1.0, %v2189_v56  ;;  %v495_v61 = vpop.xlane.xlu1 %494  ;;  %v637_v37 = vsel %vm435_vm0, %v374_v58, 0.0  ;;  %v634_v38 = vsel %vm435_vm0, %v373_v18, 0.0 }
  0xc1   : > { %2198 = vrcp.f32 %v1347_v52  ;;  %v492_v2 = vpop.xlane.xlu0 %491  ;;  %v2193_v3 = vpop.eup %2192  ;;  %v1754_v4 = vperm.slane %v2191_v59, %v3041_v17  ;;  %v841_v6 = vadd.f32 %v2940_v13, %v495_v61  ;;  %v640_v42 = vsel %vm435_vm0, %v375_v11, 0.0  ;;  %v3133_v61 = vld [vmem:[%s3751_s1] ss:$0 sm:$0xff] }
  0xc2   : > { %2200 = vpow2.f32 %v1108_v54  ;;  %v840_v50 = vadd.f32 %v2940_v13, %v492_v2  ;;  %v498_v8 = vpop.xlane.xlu2 %497  ;;  %v1348_v9 = vadd.f32 1.0, %v2193_v3  ;;  %v377_v43 = vmul.f32 %v2795_v0, %v245_v28 }
  0xc3   : > { %2202 = vrcp.f32 %v1346_v60  ;;  %v842_v10 = vadd.f32 %v2940_v13, %v498_v8  ;;  %v2195_v14 = vpop.eup %2194  ;;  %v1756_v15 = vsel %vm1755_vm9, %v1754_v4, %v1752_v45  ;;  %v969_v12 = vsub.f32 0.0, %v841_v6  ;;  %v246_v45 = vld [vmem:[%s2800_s5 + $0x238] sm:$0xff]  ;;  %v248_v8 = vld [vmem:[%s2800_s5 + $0x248] sm:$0xff] }
  0xc4   : > { %2204 = vpow2.f32 %v1112_v57  ;;  %v968_v19 = vsub.f32 0.0, %v840_v50  ;;  %v1760_v24 = vsel %vm1759_vm10, %v1758_v51, %v1756_v15  ;;  %v1762_v25 = vperm.slane %v2195_v14, %v3048_v20  ;;  %v247_v15 = vld [vmem:[%s2800_s5 + $0x240] sm:$0xff] }
  0xc5   : > { %2206 = vrcp.f32 %v1348_v9  ;;  %v970_v26 = vsub.f32 0.0, %v842_v10  ;;  %v1116_v30 = vmul.f32 1.442695, %v969_v12  ;;  %629 = vadd.xlane.f32.xlu1 %v628_v48  ;;  %626 = vadd.xlane.f32.xlu0 %v625_v55  ;;  %v376_v55 = vmul.f32 %v2795_v0, %v244_v32  ;;  %v249_v32 = vld [vmem:[%s2800_s5 + $0x250] sm:$0xff] }
  0xc6   : > { %v2197_v29 = vpop.eup %2196  ;;  %v1114_v31 = vmul.f32 1.442695, %v968_v19  ;;  %v1764_v35 = vsel %vm3755_vm11, %v1762_v25, %v1760_v24  ;;  %632 = vadd.xlane.f32.xlu2 %v631_v23  ;;  %v378_v0 = vmul.f32 %v3133_v61, %v246_v45  ;;  %v3142_v11 = vadd.s32 4294967176, %v2958_v41 }
  0xc7   : > { %v2199_v33 = vpop.eup %2198  ;;  %v1350_v36 = vadd.f32 1.0, %v2197_v29  ;;  %2208 = vpow2.f32 %v1116_v30  ;;  %v1118_v40 = vmul.f32 1.442695, %v970_v26  ;;  %v646_v25 = vsel %vm435_vm0, %v377_v43, 0.0 }
  0xc8   : > { %v2201_v39 = vpop.eup %2200  ;;  %v1770_v48 = vperm.slane %v2199_v33, %v3057_v27  ;;  %v504_v52 = vpop.xlane.xlu1 %503  ;;  %v643_v26 = vsel %vm435_vm0, %v376_v55, 0.0  ;;  %v649_v30 = vsel %vm435_vm0, %v378_v0, 0.0  ;;  %v250_v0 = vld [vmem:[%s2800_s5 + $0x258] sm:$0xff] }
  0xc9   : > { %v2203_v46 = vpop.eup %2202  ;;  %2210 = vrcp.f32 %v1350_v36  ;;  %v1349_v49 = vadd.f32 1.0, %v2201_v39  ;;  %v501_v54 = vpop.xlane.xlu0 %500  ;;  %v844_v58 = vadd.f32 %v2940_v13, %v504_v52  ;;  %v379_v39 = vmul.f32 %v3133_v61, %v247_v15 }
  0xca   : > { %v2205_v56 = vpop.eup %2204  ;;  %v1766_v57 = vperm.slane %v2203_v46, %v3076_v62  ;;  %2212 = vpow2.f32 %v1114_v31  ;;  %v843_v18 = vadd.f32 %v2940_v13, %v501_v54  ;;  %v507_v22 = vpop.xlane.xlu2 %506  ;;  %v380_v31 = vmul.f32 %v3133_v61, %v248_v8 }
  0xcb   : > { %v2207_v59 = vpop.eup %2206  ;;  %2214 = vrcp.f32 %v1349_v49  ;;  %v1351_v51 = vadd.f32 1.0, %v2205_v56  ;;  %v845_v60 = vadd.f32 %v2940_v13, %v507_v22  ;;  %v972_v3 = vsub.f32 0.0, %v844_v58  ;;  %v251_v22 = vld [vmem:[%s2800_s5 + $0x260] sm:$0xff] }
  0xcc   : > { %v1768_v2 = vsel %vm3754_vm12, %v1766_v57, %v1764_v35  ;;  %v1774_v23 = vperm.slane %v2207_v59, %v3099_v53  ;;  %2216 = vpow2.f32 %v1118_v40  ;;  %v971_v6 = vsub.f32 0.0, %v843_v18 }
  0xcd   : > { %v1772_v4 = vsel %vm1771_vm13, %v1770_v48, %v1768_v2  ;;  %2218 = vrcp.f32 %v1351_v51  ;;  %v973_v50 = vsub.f32 0.0, %v845_v60  ;;  %v2209_v9 = vpop.eup %2208  ;;  %v1122_v14 = vmul.f32 1.442695, %v972_v3  ;;  %638 = vadd.xlane.f32.xlu1 %v637_v37  ;;  %635 = vadd.xlane.f32.xlu0 %v634_v38 }
  0xce   : > { %v1776_v10 = vsel %vm1775_vm14, %v1774_v23, %v1772_v4  ;;  %v1353_v19 = vadd.f32 1.0, %v2209_v9  ;;  %v1120_v24 = vmul.f32 1.442695, %v971_v6  ;;  %641 = vadd.xlane.f32.xlu2 %v640_v42  ;;  %v381_v54 = vmul.f32 %v3133_v61, %v249_v32 }
  0xcf   : > { %v2211_v12 = vpop.eup %2210  ;;  %2220 = vpow2.f32 %v1122_v14  ;;  %v1124_v29 = vmul.f32 1.442695, %v973_v50  ;;  %v655_v4 = vsel %vm435_vm0, %v380_v31, 0.0  ;;  %v652_v6 = vsel %vm435_vm0, %v379_v39, 0.0  ;;  %v252_v14 = vld [vmem:[%s2800_s5 + $0x268] sm:$0xff] }
  0xd0   : > { %v2213_v28 = vpop.eup %2212  ;;  %v1781_v35 = vperm.slane %v2211_v12, %v2958_v41  ;;  %2222 = vrcp.f32 %v1353_v19  ;;  %v513_v37 = vpop.xlane.xlu1 %512  ;;  %v658_v9 = vsel %vm435_vm0, %v381_v54, 0.0  ;;  %v253_v54 = vld [vmem:[%s2800_s5 + $0x270] sm:$0xff] }
  0xd1   : > { %v2215_v33 = vpop.eup %2214  ;;  %v1352_v36 = vadd.f32 1.0, %v2213_v28  ;;  %v510_v38 = vpop.xlane.xlu0 %509  ;;  %2224 = vpow2.f32 %v1120_v24  ;;  %v847_v43 = vadd.f32 %v2940_v13, %v513_v37  ;;  %v384_v37 = vmul.f32 %v3133_v61, %v252_v14 }
  0xd2   : > { %v2217_v40 = vpop.eup %2216  ;;  %v1778_v42 = vperm.slane %v2215_v33, %v3142_v11  ;;  %v846_v45 = vadd.f32 %v2940_v13, %v510_v38  ;;  %v516_v46 = vpop.xlane.xlu2 %515 }
  0xd3   : > { %v2219_v48 = vpop.eup %2218  ;;  %2226 = vrcp.f32 %v1352_v36  ;;  %v1354_v49 = vadd.f32 1.0, %v2217_v40  ;;  %v848_v52 = vadd.f32 %v2940_v13, %v516_v46  ;;  %v975_v57 = vsub.f32 0.0, %v847_v43  ;;  %v254_v46 = vld [vmem:[%s2800_s5 + $0x278] sm:$0xff] }
  0xd4   : > { %v3158_v55 = vsel %vm1779_vm15, %v1778_v42, %v1776_v10  ;;  %v1782_v56 = vperm.slane %v2219_v48, %v2993_v21  ;;  %2228 = vpow2.f32 %v1124_v29  ;;  %v974_v58 = vsub.f32 0.0, %v846_v45 }
  0xd5   : > { %2230 = vrcp.f32 %v1354_v49  ;;  %v976_v18 = vsub.f32 0.0, %v848_v52  ;;  %v2221_v59 = vpop.eup %2220  ;;  %v1128_v60 = vmul.f32 1.442695, %v975_v57  ;;  %647 = vadd.xlane.f32.xlu1 %v646_v25  ;;  %644 = vadd.xlane.f32.xlu0 %v643_v26  ;;  %v383_v10 = vmul.f32 %v3133_v61, %v251_v22 }
  0xd6   : > { %v1783_v51 = vsel %vm1723_vm1, %v1782_v56, %v1781_v35  ;;  %v2223_v2 = vpop.eup %2222  ;;  %v1356_v23 = vadd.f32 1.0, %v2221_v59  ;;  %v1126_v3 = vmul.f32 1.442695, %v974_v58  ;;  %650 = vadd.xlane.f32.xlu2 %v649_v30  ;;  %v382_v26 = vmul.f32 %v3133_v61, %v250_v0 }
  0xd7   : > { %v2225_v50 = vpop.eup %2224  ;;  %2232 = vpow2.f32 %v1128_v60  ;;  %v1130_v8 = vmul.f32 1.442695, %v976_v18  ;;  %v1786_v12 = vperm.slane %v2223_v2, %v2984_v7  ;;  %v664_v18 = vsel %vm435_vm0, %v383_v10, 0.0  ;;  %v255_v2 = vld [vmem:[%s2800_s5 + $0x280] sm:$0xff] }
  0xd8   : > { %2234 = vrcp.f32 %v1356_v23  ;;  %v1355_v19 = vadd.f32 1.0, %v2225_v50  ;;  %v522_v24 = vpop.xlane.xlu1 %521  ;;  %v661_v22 = vsel %vm435_vm0, %v382_v26, 0.0  ;;  %v667_v60 = vsel %vm435_vm0, %v384_v37, 0.0 }
  0xd9   : > { %v2227_v15 = vpop.eup %2226  ;;  %v519_v25 = vpop.xlane.xlu0 %518  ;;  %2236 = vpow2.f32 %v1126_v3  ;;  %v850_v30 = vadd.f32 %v2940_v13, %v522_v24  ;;  %v386_v0 = vmul.f32 %v3133_v61, %v254_v46  ;;  %v387_v26 = vmul.f32 %v3133_v61, %v255_v2 }
  0xda   : > { %v2229_v28 = vpop.eup %2228  ;;  %v1784_v29 = vperm.slane %v2227_v15, %v2975_v63  ;;  %v849_v31 = vadd.f32 %v2940_v13, %v519_v25  ;;  %v525_v32 = vpop.xlane.xlu2 %524  ;;  %2238 = vrcp.f32 %v1355_v19 }
  0xdb   : > { %v2231_v33 = vpop.eup %2230  ;;  %v1357_v35 = vadd.f32 1.0, %v2229_v28  ;;  %v851_v36 = vadd.f32 %v2940_v13, %v525_v32  ;;  %2240 = vpow2.f32 %v1130_v8  ;;  %v978_v40 = vsub.f32 0.0, %v850_v30 }
  0xdc   : > { %v1785_v38 = vsel %vm1727_vm2, %v1784_v29, %v1783_v51  ;;  %v1788_v39 = vperm.slane %v2231_v33, %v2978_v1  ;;  %v977_v43 = vsub.f32 0.0, %v849_v31  ;;  %v385_v8 = vmul.f32 %v3133_v61, %v253_v54 }
  0xdd   : > { %v1787_v42 = vsel %vm1731_vm3, %v1786_v12, %v1785_v38  ;;  %2242 = vrcp.f32 %v1357_v35  ;;  %v979_v45 = vsub.f32 0.0, %v851_v36  ;;  %v2233_v48 = vpop.eup %2232  ;;  %v1134_v52 = vmul.f32 1.442695, %v978_v40  ;;  %656 = vadd.xlane.f32.xlu1 %v655_v4  ;;  %653 = vadd.xlane.f32.xlu0 %v652_v6  ;;  %v257_v35 = vld [vmem:[%s2800_s5 + $0x290] sm:$0xff] }
  0xde   : > { %v1789_v49 = vsel %vm1735_vm4, %v1788_v39, %v1787_v42  ;;  %v2235_v56 = vpop.eup %2234  ;;  %v1359_v57 = vadd.f32 1.0, %v2233_v48  ;;  %v1132_v58 = vmul.f32 1.442695, %v977_v43  ;;  %659 = vadd.xlane.f32.xlu2 %v658_v9  ;;  %v256_v39 = vld [vmem:[%s2800_s5 + $0x288] sm:$0xff]  ;;  %v670_v46 = vsel %vm435_vm0, %v385_v8, 0.0 }
  0xdf   : > { %v2237_v59 = vpop.eup %2236  ;;  %2244 = vpow2.f32 %v1134_v52  ;;  %v1136_v51 = vmul.f32 1.442695, %v979_v45  ;;  %v1792_v3 = vperm.slane %v2235_v56, %v3018_v47  ;;  %v673_v45 = vsel %vm435_vm0, %v386_v0, 0.0  ;;  %v258_v56 = vld [vmem:[%s2800_s5 + $0x298] sm:$0xff] }
  0xe0   : > { %v2239_v23 = vpop.eup %2238  ;;  %2246 = vrcp.f32 %v1359_v57  ;;  %v1358_v4 = vadd.f32 1.0, %v2237_v59  ;;  %v531_v6 = vpop.xlane.xlu1 %530  ;;  %v676_v52 = vsel %vm435_vm0, %v387_v26, 0.0  ;;  %v389_v54 = vmul.f32 %v3133_v61, %v257_v35 }
  0xe1   : > { %v528_v50 = vpop.xlane.xlu0 %527  ;;  %v2241_v9 = vpop.eup %2240  ;;  %v1790_v10 = vperm.slane %v2239_v23, %v3007_v34  ;;  %2248 = vpow2.f32 %v1132_v58  ;;  %v853_v14 = vadd.f32 %v2940_v13, %v531_v6  ;;  %v390_v8 = vmul.f32 %v3133_v61, %v258_v56 }
  0xe2   : > { %v852_v15 = vadd.f32 %v2940_v13, %v528_v50  ;;  %v534_v12 = vpop.xlane.xlu2 %533  ;;  %2250 = vrcp.f32 %v1358_v4  ;;  %v1360_v24 = vadd.f32 1.0, %v2241_v9 }
  0xe3   : > { %v2243_v19 = vpop.eup %2242  ;;  %v854_v25 = vadd.f32 %v2940_v13, %v534_v12  ;;  %v1791_v28 = vsel %vm1739_vm5, %v1790_v10, %v1789_v49  ;;  %2252 = vpow2.f32 %v1136_v51  ;;  %v981_v30 = vsub.f32 0.0, %v853_v14 }
  0xe4   : > { %v1794_v29 = vperm.slane %v2243_v19, %v3013_v44  ;;  %v1793_v31 = vsel %vm1743_vm6, %v1792_v3, %v1791_v28  ;;  %2254 = vrcp.f32 %v1360_v24  ;;  %v980_v32 = vsub.f32 0.0, %v852_v15  ;;  %v260_v28 = vld [vmem:[%s2800_s5 + $0x2a8] sm:$0xff] }
  0xe5   : > { %v982_v33 = vsub.f32 0.0, %v854_v25  ;;  %v2245_v36 = vpop.eup %2244  ;;  %v1140_v38 = vmul.f32 1.442695, %v981_v30  ;;  %665 = vadd.xlane.f32.xlu1 %v664_v18  ;;  %662 = vadd.xlane.f32.xlu0 %v661_v22  ;;  %v388_v51 = vmul.f32 %v3133_v61, %v256_v39 }
  0xe6   : > { %v1795_v37 = vsel %vm1747_vm7, %v1794_v29, %v1793_v31  ;;  %v2247_v40 = vpop.eup %2246  ;;  %v1362_v42 = vadd.f32 1.0, %v2245_v36  ;;  %v1138_v43 = vmul.f32 1.442695, %v980_v32  ;;  %668 = vadd.xlane.f32.xlu2 %v667_v60  ;;  %v682_v32 = vsel %vm435_vm0, %v389_v54, 0.0 }
  0xe7   : > { %v2249_v48 = vpop.eup %2248  ;;  %2256 = vpow2.f32 %v1140_v38  ;;  %v1142_v49 = vmul.f32 1.442695, %v982_v33  ;;  %v1798_v58 = vperm.slane %v2247_v40, %v3041_v17  ;;  %v679_v36 = vsel %vm435_vm0, %v388_v51, 0.0  ;;  %v259_v38 = vld [vmem:[%s2800_s5 + $0x2a0] sm:$0xff] }
  0xe8   : > { %v2251_v57 = vpop.eup %2250  ;;  %2258 = vrcp.f32 %v1362_v42  ;;  %v1361_v18 = vadd.f32 1.0, %v2249_v48  ;;  %v540_v22 = vpop.xlane.xlu1 %539 }
  0xe9   : > { %v537_v59 = vpop.xlane.xlu0 %536  ;;  %v2253_v60 = vpop.eup %2252  ;;  %v1796_v0 = vperm.slane %v2251_v57, %v3032_v5  ;;  %2260 = vpow2.f32 %v1138_v43  ;;  %v856_v2 = vadd.f32 %v2940_v13, %v540_v22  ;;  %v391_v22 = vmul.f32 %v3133_v61, %v259_v38 }
  0xea   : > { %v855_v23 = vadd.f32 %v2940_v13, %v537_v59  ;;  %v543_v3 = vpop.xlane.xlu2 %542  ;;  %v2255_v4 = vpop.eup %2254  ;;  %2262 = vrcp.f32 %v1361_v18  ;;  %v1363_v6 = vadd.f32 1.0, %v2253_v60  ;;  %v261_v59 = vld [vmem:[%s2800_s5 + $0x2b0] sm:$0xff] }
  0xeb   : > { %v857_v50 = vadd.f32 %v2940_v13, %v543_v3  ;;  %v1797_v9 = vsel %vm1751_vm8, %v1796_v0, %v1795_v37  ;;  %v1800_v10 = vperm.slane %v2255_v4, %v3038_v16  ;;  %2264 = vpow2.f32 %v1142_v49  ;;  %v263_v4 = vld [vmem:[%s2800_s5 + $0x2c0] sm:$0xff] }
  0xec   : > { %v984_v14 = vsub.f32 0.0, %v856_v2  ;;  %v1799_v15 = vsel %vm1755_vm9, %v1798_v58, %v1797_v9  ;;  %2266 = vrcp.f32 %v1363_v6  ;;  %v983_v12 = vsub.f32 0.0, %v855_v23 }
  0xed   : > { %v985_v19 = vsub.f32 0.0, %v857_v50  ;;  %v2257_v24 = vpop.eup %2256  ;;  %v1801_v25 = vsel %vm1759_vm10, %v1800_v10, %v1799_v15  ;;  %674 = vadd.xlane.f32.xlu1 %v673_v45  ;;  %671 = vadd.xlane.f32.xlu0 %v670_v46  ;;  %v685_v37 = vsel %vm435_vm0, %v390_v8, 0.0  ;;  %v392_v46 = vmul.f32 %v3133_v61, %v260_v28 }
  0xee   : > { %v1146_v26 = vmul.f32 1.442695, %v984_v14  ;;  %v2259_v29 = vpop.eup %2258  ;;  %v1365_v30 = vadd.f32 1.0, %v2257_v24  ;;  %v1144_v31 = vmul.f32 1.442695, %v983_v12  ;;  %677 = vadd.xlane.f32.xlu2 %v676_v52  ;;  %v393_v10 = vmul.f32 %v3133_v61, %v261_v59  ;;  %v262_v14 = vld [vmem:[%s2800_s5 + $0x2b8] sm:$0xff] }
  0xef   : > { %v2261_v33 = vpop.eup %2260  ;;  %v1148_v35 = vmul.f32 1.442695, %v985_v19  ;;  %v1804_v40 = vperm.slane %v2259_v29, %v3076_v62  ;;  %v691_v9 = vsel %vm435_vm0, %v392_v46, 0.0  ;;  %v395_v28 = vmul.f32 %v3133_v61, %v263_v4  ;;  %v264_v29 = vld [vmem:[%s2800_s5 + $0x2c8] sm:$0xff] }
  0xf0   : > { %2268 = vpow2.f32 %v1146_v26  ;;  %v2263_v39 = vpop.eup %2262  ;;  %v1364_v42 = vadd.f32 1.0, %v2261_v33  ;;  %v549_v43 = vpop.xlane.xlu1 %548  ;;  %v688_v26 = vsel %vm435_vm0, %v391_v22, 0.0  ;;  %v396_v46 = vmul.f32 %v3133_v61, %v264_v29 }
  0xf1   : > { %2270 = vrcp.f32 %v1365_v30  ;;  %v546_v45 = vpop.xlane.xlu0 %545  ;;  %v2265_v48 = vpop.eup %2264  ;;  %v1802_v49 = vperm.slane %v2263_v39, %v3048_v20  ;;  %v859_v52 = vadd.f32 %v2940_v13, %v549_v43 }
  0xf2   : > { %2272 = vpow2.f32 %v1144_v31  ;;  %v858_v54 = vadd.f32 %v2940_v13, %v546_v45  ;;  %v552_v56 = vpop.xlane.xlu2 %551  ;;  %v2267_v57 = vpop.eup %2266  ;;  %v1366_v58 = vadd.f32 1.0, %v2265_v48 }
  0xf3   : > { %2274 = vrcp.f32 %v1364_v42  ;;  %v860_v18 = vadd.f32 %v2940_v13, %v552_v56  ;;  %v1803_v51 = vsel %vm3755_vm11, %v1802_v49, %v1801_v25  ;;  %v1806_v60 = vperm.slane %v2267_v57, %v3057_v27 }
  0xf4   : > { %2276 = vpow2.f32 %v1148_v35  ;;  %v987_v0 = vsub.f32 0.0, %v859_v52  ;;  %v1805_v2 = vsel %vm3754_vm12, %v1804_v40, %v1803_v51  ;;  %v986_v23 = vsub.f32 0.0, %v858_v54 }
  0xf5   : > { %v988_v3 = vsub.f32 0.0, %v860_v18  ;;  %v1807_v50 = vsel %vm1771_vm13, %v1806_v60, %v1805_v2  ;;  %683 = vadd.xlane.f32.xlu1 %v682_v32  ;;  %680 = vadd.xlane.f32.xlu0 %v679_v36  ;;  %2278 = vrcp.f32 %v1366_v58  ;;  %vm1998_vm12 = vcmask 1041409   ;;  %v266_v18 = vld [vmem:[%s2800_s5 + $0x2d8] sm:$0xff]  ;;  %v265_v60 = vld [vmem:[%s2800_s5 + $0x2d0] sm:$0xff] }
  0xf6   : > { %v2269_v6 = vpop.eup %2268  ;;  %v1152_v8 = vmul.f32 1.442695, %v987_v0  ;;  %v1150_v19 = vmul.f32 1.442695, %v986_v23  ;;  %686 = vadd.xlane.f32.xlu2 %v685_v37  ;;  %v394_v36 = vmul.f32 %v3133_v61, %v262_v14  ;;  %v694_v52 = vsel %vm435_vm0, %v393_v10, 0.0  ;;  %v267_v14 = vld [vmem:[%s2800_s5 + $0x2e0] sm:$0xff] }
  0xf7   : > { %v2271_v15 = vpop.eup %2270  ;;  %v1368_v12 = vadd.f32 1.0, %v2269_v6  ;;  %v1154_v25 = vmul.f32 1.442695, %v988_v3  ;;  %v700_v51 = vsel %vm435_vm0, %v395_v28, 0.0  ;;  %v703_v6 = vsel %vm435_vm0, %v396_v46, 0.0 }
  0xf8   : > { %v2273_v24 = vpop.eup %2272  ;;  %2280 = vpow2.f32 %v1152_v8  ;;  %v1810_v31 = vperm.slane %v2271_v15, %v3142_v11  ;;  %v558_v33 = vpop.xlane.xlu1 %557  ;;  %v697_v4 = vsel %vm435_vm0, %v394_v36, 0.0  ;;  %v398_v10 = vmul.f32 %v3133_v61, %v266_v18 }
  0xf9   : > { %v2275_v30 = vpop.eup %2274  ;;  %2282 = vrcp.f32 %v1368_v12  ;;  %v1367_v32 = vadd.f32 1.0, %v2273_v24  ;;  %v555_v35 = vpop.xlane.xlu0 %554  ;;  %v862_v39 = vadd.f32 %v2940_v13, %v558_v33  ;;  %v399_v36 = vmul.f32 %v3133_v61, %v267_v14 }
  0xfa   : > { %v2277_v38 = vpop.eup %2276  ;;  %v1808_v37 = vperm.slane %v2275_v30, %v3099_v53  ;;  %2284 = vpow2.f32 %v1150_v19  ;;  %v861_v40 = vadd.f32 %v2940_v13, %v555_v35  ;;  %v561_v42 = vpop.xlane.xlu2 %560 }
  0xfb   : > { %2286 = vrcp.f32 %v1367_v32  ;;  %v1369_v43 = vadd.f32 1.0, %v2277_v38  ;;  %v863_v45 = vadd.f32 %v2940_v13, %v561_v42  ;;  %v990_v49 = vsub.f32 0.0, %v862_v39  ;;  %v2279_v54 = vpop.eup %2278 }
  0xfc   : > { %v1809_v48 = vsel %vm1775_vm14, %v1808_v37, %v1807_v50  ;;  %2288 = vpow2.f32 %v1154_v25  ;;  %v989_v57 = vsub.f32 0.0, %v861_v40  ;;  %v1812_v8 = vperm.slane %v2279_v54, %v2958_v41 }
  0xfd   : > { %v1811_v56 = vsel %vm1779_vm15, %v1810_v31, %v1809_v48  ;;  %2290 = vrcp.f32 %v1369_v43  ;;  %v991_v58 = vsub.f32 0.0, %v863_v45  ;;  %v1158_v59 = vmul.f32 1.442695, %v990_v49  ;;  %692 = vadd.xlane.f32.xlu1 %v691_v9  ;;  %689 = vadd.xlane.f32.xlu0 %v688_v26  ;;  %v269_v45 = vld [vmem:[%s2800_s5 + $0x2f0] sm:$0xff] }
  0xfe   : > { %v2281_v22 = vpop.eup %2280  ;;  %v3255_v0 = vsel %vm1998_vm12, %v1811_v56, %v3158_v55  ;;  %v1156_v3 = vmul.f32 1.442695, %v989_v57  ;;  %695 = vadd.xlane.f32.xlu2 %v694_v52  ;;  %v397_v25 = vmul.f32 %v3133_v61, %v265_v60  ;;  %v268_v52 = vld [vmem:[%s2800_s5 + $0x2e8] sm:$0xff]  ;;  %v712_v60 = vsel %vm435_vm0, %v399_v36, 0.0 }
  0xff   : > { %v2283_v2 = vpop.eup %2282  ;;  %v1371_v23 = vadd.f32 1.0, %v2281_v22  ;;  %2292 = vpow2.f32 %v1158_v59  ;;  %v1160_v9 = vmul.f32 1.442695, %v991_v58  ;;  %v709_v58 = vsel %vm435_vm0, %v398_v10, 0.0 }
 0x100   : > { %v2285_v50 = vpop.eup %2284  ;;  %v1815_v55 = vperm.slane %v2283_v2, %v2975_v63  ;;  %v567_v19 = vpop.xlane.xlu1 %566  ;;  %v706_v18 = vsel %vm435_vm0, %v397_v25, 0.0  ;;  %v401_v2 = vmul.f32 %v3133_v61, %v269_v45  ;;  %vm3758_vm12 = vcmask 851712  }
 0x101   : > { %v2287_v15 = vpop.eup %2286  ;;  %2294 = vrcp.f32 %v1371_v23  ;;  %v1370_v12 = vadd.f32 1.0, %v2285_v50  ;;  %v564_v24 = vpop.xlane.xlu0 %563  ;;  %v865_v29 = vadd.f32 %v2940_v13, %v567_v19  ;;  %v270_v23 = vld [vmem:[%s2800_s5 + $0x2f8] sm:$0xff] }
 0x102   : > { %v2289_v26 = vpop.eup %2288  ;;  %v1813_v28 = vperm.slane %v2287_v15, %v2993_v21  ;;  %2296 = vpow2.f32 %v1156_v3  ;;  %v864_v30 = vadd.f32 %v2940_v13, %v564_v24  ;;  %v570_v31 = vpop.xlane.xlu2 %569  ;;  %v402_v25 = vmul.f32 %v3133_v61, %v270_v23 }
 0x103   : > { %v2291_v32 = vpop.eup %2290  ;;  %2298 = vrcp.f32 %v1370_v12  ;;  %v1372_v33 = vadd.f32 1.0, %v2289_v26  ;;  %v866_v35 = vadd.f32 %v2940_v13, %v570_v31  ;;  %v993_v39 = vsub.f32 0.0, %v865_v29 }
 0x104   : > { %v1814_v38 = vsel %vm1723_vm1, %v1813_v28, %v1812_v8  ;;  %v1817_v37 = vperm.slane %v2291_v32, %v2984_v7  ;;  %2300 = vpow2.f32 %v1160_v9  ;;  %v992_v42 = vsub.f32 0.0, %v864_v30 }
 0x105   : > { %v1816_v40 = vsel %vm1727_vm2, %v1815_v55, %v1814_v38  ;;  %2302 = vrcp.f32 %v1372_v33  ;;  %v994_v43 = vsub.f32 0.0, %v866_v35  ;;  %v2293_v46 = vpop.eup %2292  ;;  %v1164_v49 = vmul.f32 1.442695, %v993_v39  ;;  %701 = vadd.xlane.f32.xlu1 %v700_v51  ;;  %698 = vadd.xlane.f32.xlu0 %v697_v4  ;;  %v272_v33 = vld [vmem:[%s2800_s5 + $0x308] sm:$0xff] }
 0x106   : > { %v1818_v48 = vsel %vm1731_vm3, %v1817_v37, %v1816_v40  ;;  %v1374_v56 = vadd.f32 1.0, %v2293_v46  ;;  %v1162_v57 = vmul.f32 1.442695, %v992_v42  ;;  %704 = vadd.xlane.f32.xlu2 %v703_v6  ;;  %v400_v6 = vmul.f32 %v3133_v61, %v268_v52  ;;  %v271_v37 = vld [vmem:[%s2800_s5 + $0x300] sm:$0xff] }
 0x107   : > { %v2295_v54 = vpop.eup %2294  ;;  %2304 = vpow2.f32 %v1164_v49  ;;  %v1166_v59 = vmul.f32 1.442695, %v994_v43  ;;  %v718_v43 = vsel %vm435_vm0, %v401_v2, 0.0  ;;  %v721_v49 = vsel %vm435_vm0, %v402_v25, 0.0 }
 0x108   : > { %v2297_v22 = vpop.eup %2296  ;;  %v1821_v51 = vperm.slane %v2295_v54, %v3007_v34  ;;  %2306 = vrcp.f32 %v1374_v56  ;;  %v576_v50 = vpop.xlane.xlu1 %575  ;;  %v715_v45 = vsel %vm435_vm0, %v400_v6, 0.0  ;;  %v404_v52 = vmul.f32 %v3133_v61, %v272_v33  ;;  %v273_v54 = vld [vmem:[%s2800_s5 + $0x310] sm:$0xff] }
 0x109   : > { %v2299_v3 = vpop.eup %2298  ;;  %v1373_v4 = vadd.f32 1.0, %v2297_v22  ;;  %v573_v8 = vpop.xlane.xlu0 %572  ;;  %2308 = vpow2.f32 %v1162_v57  ;;  %v868_v14 = vadd.f32 %v2940_v13, %v576_v50  ;;  %v405_v6 = vmul.f32 %v3133_v61, %v273_v54 }
 0x10a   : > { %v2301_v9 = vpop.eup %2300  ;;  %v1819_v10 = vperm.slane %v2299_v3, %v2978_v1  ;;  %v867_v15 = vadd.f32 %v2940_v13, %v573_v8  ;;  %v579_v55 = vpop.xlane.xlu2 %578 }
 0x10b   : > { %v2303_v12 = vpop.eup %2302  ;;  %2310 = vrcp.f32 %v1373_v4  ;;  %v1375_v19 = vadd.f32 1.0, %v2301_v9  ;;  %v869_v24 = vadd.f32 %v2940_v13, %v579_v55  ;;  %v996_v29 = vsub.f32 0.0, %v868_v14 }
 0x10c   : > { %v1820_v26 = vsel %vm1735_vm4, %v1819_v10, %v1818_v48  ;;  %v1823_v28 = vperm.slane %v2303_v12, %v3018_v47  ;;  %2312 = vpow2.f32 %v1166_v59  ;;  %v995_v31 = vsub.f32 0.0, %v867_v15 }
 0x10d   : > { %v1822_v30 = vsel %vm1739_vm5, %v1821_v51, %v1820_v26  ;;  %2314 = vrcp.f32 %v1375_v19  ;;  %v997_v32 = vsub.f32 0.0, %v869_v24  ;;  %v2305_v35 = vpop.eup %2304  ;;  %v1170_v38 = vmul.f32 1.442695, %v996_v29  ;;  %710 = vadd.xlane.f32.xlu1 %v709_v58  ;;  %707 = vadd.xlane.f32.xlu0 %v706_v18  ;;  %v275_v19 = vld [vmem:[%s2800_s5 + $0x320] sm:$0xff] }
 0x10e   : > { %v1824_v36 = vsel %vm1743_vm6, %v1823_v28, %v1822_v30  ;;  %v2307_v39 = vpop.eup %2306  ;;  %v1377_v40 = vadd.f32 1.0, %v2305_v35  ;;  %v1168_v42 = vmul.f32 1.442695, %v995_v31  ;;  %713 = vadd.xlane.f32.xlu2 %v712_v60  ;;  %v403_v59 = vmul.f32 %v3133_v61, %v271_v37  ;;  %v274_v28 = vld [vmem:[%s2800_s5 + $0x318] sm:$0xff] }
 0x10f   : > { %v2309_v46 = vpop.eup %2308  ;;  %2316 = vpow2.f32 %v1170_v38  ;;  %v1172_v48 = vmul.f32 1.442695, %v997_v32  ;;  %v1827_v57 = vperm.slane %v2307_v39, %v3032_v5  ;;  %v727_v32 = vsel %vm435_vm0, %v404_v52, 0.0  ;;  %v287_v39 = vld [vmem:[%s2800_s5 + $0x380] sm:$0xff] }
 0x110   : > { %2318 = vrcp.f32 %v1377_v40  ;;  %v1376_v58 = vadd.f32 1.0, %v2309_v46  ;;  %v585_v18 = vpop.xlane.xlu1 %584  ;;  %v724_v33 = vsel %vm435_vm0, %v403_v59, 0.0  ;;  %v730_v38 = vsel %vm435_vm0, %v405_v6, 0.0 }
 0x111   : > { %v2311_v56 = vpop.eup %2310  ;;  %v582_v22 = vpop.xlane.xlu0 %581  ;;  %2320 = vpow2.f32 %v1168_v42  ;;  %v871_v23 = vadd.f32 %v2940_v13, %v585_v18  ;;  %v407_v37 = vmul.f32 %v3133_v61, %v275_v19  ;;  %v419_v59 = vmul.f32 %v3133_v61, %v287_v39 }
 0x112   : > { %v2313_v60 = vpop.eup %2312  ;;  %v1825_v2 = vperm.slane %v2311_v56, %v3013_v44  ;;  %v870_v3 = vadd.f32 %v2940_v13, %v582_v22  ;;  %v588_v51 = vpop.xlane.xlu2 %587  ;;  %2322 = vrcp.f32 %v1376_v58 }
 0x113   : > { %v2315_v4 = vpop.eup %2314  ;;  %v1378_v50 = vadd.f32 1.0, %v2313_v60  ;;  %v872_v8 = vadd.f32 %v2940_v13, %v588_v51  ;;  %2324 = vpow2.f32 %v1172_v48  ;;  %v999_v14 = vsub.f32 0.0, %v871_v23 }
 0x114   : > { %v1826_v9 = vsel %vm1747_vm7, %v1825_v2, %v1824_v36  ;;  %v1829_v10 = vperm.slane %v2315_v4, %v3041_v17  ;;  %v998_v55 = vsub.f32 0.0, %v870_v3  ;;  %v406_v48 = vmul.f32 %v3133_v61, %v274_v28 }
 0x115   : > { %v1828_v15 = vsel %vm1751_vm8, %v1827_v57, %v1826_v9  ;;  %2326 = vrcp.f32 %v1378_v50  ;;  %v1000_v12 = vsub.f32 0.0, %v872_v8  ;;  %v2317_v24 = vpop.eup %2316  ;;  %v1176_v26 = vmul.f32 1.442695, %v999_v14  ;;  %719 = vadd.xlane.f32.xlu1 %v718_v43  ;;  %716 = vadd.xlane.f32.xlu0 %v715_v45  ;;  %v289_v50 = vld [vmem:[%s2800_s5 + $0x390] sm:$0xff] }
 0x116   : > { %v1830_v25 = vsel %vm1755_vm9, %v1829_v10, %v1828_v15  ;;  %v2319_v29 = vpop.eup %2318  ;;  %v1380_v30 = vadd.f32 1.0, %v2317_v24  ;;  %v1174_v31 = vmul.f32 1.442695, %v998_v55  ;;  %722 = vadd.xlane.f32.xlu2 %v721_v49  ;;  %v288_v10 = vld [vmem:[%s2800_s5 + $0x388] sm:$0xff]  ;;  %v733_v19 = vsel %vm435_vm0, %v406_v48, 0.0 }
 0x117   : > { %v2321_v35 = vpop.eup %2320  ;;  %2328 = vpow2.f32 %v1176_v26  ;;  %v1178_v36 = vmul.f32 1.442695, %v1000_v12  ;;  %v1833_v42 = vperm.slane %v2319_v29, %v3048_v20  ;;  %v736_v12 = vsel %vm435_vm0, %v407_v37, 0.0  ;;  %v290_v29 = vld [vmem:[%s2800_s5 + $0x398] sm:$0xff] }
 0x118   : > { %v2323_v40 = vpop.eup %2322  ;;  %2330 = vrcp.f32 %v1380_v30  ;;  %v1379_v43 = vadd.f32 1.0, %v2321_v35  ;;  %v594_v45 = vpop.xlane.xlu1 %593  ;;  %v772_v26 = vsel %vm435_vm0, %v419_v59, 0.0  ;;  %v421_v28 = vmul.f32 %v3133_v61, %v289_v50 }
 0x119   : > { %v591_v46 = vpop.xlane.xlu0 %590  ;;  %v2325_v49 = vpop.eup %2324  ;;  %v1831_v52 = vperm.slane %v2323_v40, %v3038_v16  ;;  %2332 = vpow2.f32 %v1174_v31  ;;  %v874_v54 = vadd.f32 %v2940_v13, %v594_v45  ;;  %v422_v48 = vmul.f32 %v3133_v61, %v290_v29 }
 0x11a   : > { %v873_v56 = vadd.f32 %v2940_v13, %v591_v46  ;;  %v597_v57 = vpop.xlane.xlu2 %596  ;;  %2334 = vrcp.f32 %v1379_v43  ;;  %v1381_v18 = vadd.f32 1.0, %v2325_v49 }
 0x11b   : > { %v2327_v58 = vpop.eup %2326  ;;  %v875_v22 = vadd.f32 %v2940_v13, %v597_v57  ;;  %v1832_v60 = vsel %vm1759_vm10, %v1831_v52, %v1830_v25  ;;  %2336 = vpow2.f32 %v1178_v36  ;;  %v1002_v23 = vsub.f32 0.0, %v874_v54 }
 0x11c   : > { %v1835_v2 = vperm.slane %v2327_v58, %v3076_v62  ;;  %v1834_v3 = vsel %vm3755_vm11, %v1833_v42, %v1832_v60  ;;  %2338 = vrcp.f32 %v1381_v18  ;;  %v1001_v51 = vsub.f32 0.0, %v873_v56  ;;  %v291_v18 = vld [vmem:[%s2800_s5 + $0x3a0] sm:$0xff] }
 0x11d   : > { %v1003_v4 = vsub.f32 0.0, %v875_v22  ;;  %v2329_v8 = vpop.eup %2328  ;;  %v1182_v9 = vmul.f32 1.442695, %v1002_v23  ;;  %728 = vadd.xlane.f32.xlu1 %v727_v32  ;;  %725 = vadd.xlane.f32.xlu0 %v724_v33  ;;  %v420_v36 = vmul.f32 %v3133_v61, %v288_v10  ;;  %v778_v61 = vsel %vm435_vm0, %v421_v28, 0.0  ;;  %v3354_v10 = vld [vmem:[%s3751_s1] ss:$0 sm:$0xff] }
 0x11e   : > { %v1836_v6 = vsel %vm3758_vm12, %v1835_v2, %v1834_v3  ;;  %v2331_v14 = vpop.eup %2330  ;;  %v1383_v15 = vadd.f32 1.0, %v2329_v8  ;;  %v1180_v55 = vmul.f32 1.442695, %v1001_v51  ;;  %731 = vadd.xlane.f32.xlu2 %v730_v38  ;;  %v276_v2 = vld [vmem:[%s2800_s5 + $0x328] sm:$0xff]  ;;  %vm2000_vm12 = vcmask 1042434  }
 0x11f   : > { %v2333_v24 = vpop.eup %2332  ;;  %2340 = vpow2.f32 %v1182_v9  ;;  %v1184_v25 = vmul.f32 1.442695, %v1003_v4  ;;  %v1839_v31 = vperm.slane %v2331_v14, %v3099_v53  ;;  %v775_v4 = vsel %vm435_vm0, %v420_v36, 0.0 }
 0x120   : > { %v2335_v30 = vpop.eup %2334  ;;  %2342 = vrcp.f32 %v1383_v15  ;;  %v1382_v32 = vadd.f32 1.0, %v2333_v24  ;;  %v603_v33 = vpop.xlane.xlu1 %602  ;;  %v781_v50 = vsel %vm435_vm0, %v422_v48, 0.0  ;;  %v423_v14 = vmul.f32 %v3354_v10, %v291_v18  ;;  %v277_v15 = vld [vmem:[%s2800_s5 + $0x330] sm:$0xff] }
 0x121   : > { %v600_v35 = vpop.xlane.xlu0 %599  ;;  %v2337_v38 = vpop.eup %2336  ;;  %v1837_v37 = vperm.slane %v2335_v30, %v3057_v27  ;;  %2344 = vpow2.f32 %v1180_v55  ;;  %v877_v39 = vadd.f32 %v2940_v13, %v603_v33 }
 0x122   : > { %v876_v40 = vadd.f32 %v2940_v13, %v600_v35  ;;  %v606_v42 = vpop.xlane.xlu2 %605  ;;  %v2339_v43 = vpop.eup %2338  ;;  %2346 = vrcp.f32 %v1382_v32  ;;  %v1384_v45 = vadd.f32 1.0, %v2337_v38  ;;  %v409_v38 = vmul.f32 %v3354_v10, %v277_v15 }
 0x123   : > { %v878_v46 = vadd.f32 %v2940_v13, %v606_v42  ;;  %v1838_v49 = vsel %vm1771_vm13, %v1837_v37, %v1836_v6  ;;  %v1841_v52 = vperm.slane %v2339_v43, %v3142_v11  ;;  %2348 = vpow2.f32 %v1184_v25  ;;  %v278_v43 = vld [vmem:[%s2800_s5 + $0x338] sm:$0xff] }
 0x124   : > { %v1005_v54 = vsub.f32 0.0, %v877_v39  ;;  %v1840_v56 = vsel %vm1775_vm14, %v1839_v31, %v1838_v49  ;;  %2350 = vrcp.f32 %v1384_v45  ;;  %v1004_v57 = vsub.f32 0.0, %v876_v40  ;;  %v292_v49 = vld [vmem:[%s2800_s5 + $0x3a8] sm:$0xff] }
 0x125   : > { %v1006_v58 = vsub.f32 0.0, %v878_v46  ;;  %v2341_v22 = vpop.eup %2340  ;;  %v1842_v59 = vsel %vm1779_vm15, %v1841_v52, %v1840_v56  ;;  %737 = vadd.xlane.f32.xlu1 %v736_v12  ;;  %734 = vadd.xlane.f32.xlu0 %v733_v19  ;;  %v408_v25 = vmul.f32 %v3354_v10, %v276_v2  ;;  %v293_v2 = vld [vmem:[%s2800_s5 + $0x3b0] sm:$0xff] }
 0x126   : > { %v1188_v60 = vmul.f32 1.442695, %v1005_v54  ;;  %v2343_v23 = vpop.eup %2342  ;;  %v1386_v3 = vadd.f32 1.0, %v2341_v22  ;;  %v1186_v51 = vmul.f32 1.442695, %v1004_v57  ;;  %773 = vadd.xlane.f32.xlu2 %v772_v26  ;;  %v3361_v26 = vsel %vm2000_vm12, %v1842_v59, %v3255_v0 }
 0x127   : > { %v2345_v8 = vpop.eup %2344  ;;  %v1844_v6 = vperm.slane %v2343_v23, %v2993_v21  ;;  %v1190_v9 = vmul.f32 1.442695, %v1006_v58  ;;  %v784_v57 = vsel %vm435_vm0, %v423_v14, 0.0  ;;  %v739_v58 = vsel %vm435_vm0, %v408_v25, 0.0 }
 0x128   : > { %2352 = vpow2.f32 %v1188_v60  ;;  %v2347_v55 = vpop.eup %2346  ;;  %v1385_v12 = vadd.f32 1.0, %v2345_v8  ;;  %v612_v19 = vpop.xlane.xlu1 %611  ;;  %v742_v59 = vsel %vm435_vm0, %v409_v38, 0.0  ;;  %v410_v60 = vmul.f32 %v3354_v10, %v278_v43 }
 0x129   : > { %2354 = vrcp.f32 %v1386_v3  ;;  %v609_v24 = vpop.xlane.xlu0 %608  ;;  %v2349_v28 = vpop.eup %2348  ;;  %v1843_v29 = vperm.slane %v2347_v55, %v2958_v41  ;;  %v880_v30 = vadd.f32 %v2940_v13, %v612_v19  ;;  %vm3759_vm12 = vcmask 851712  }
 0x12a   : > { %2356 = vpow2.f32 %v1186_v51  ;;  %v879_v31 = vadd.f32 %v2940_v13, %v609_v24  ;;  %v615_v32 = vpop.xlane.xlu2 %614  ;;  %v2351_v33 = vpop.eup %2350  ;;  %v1387_v35 = vadd.f32 1.0, %v2349_v28  ;;  %v425_v24 = vmul.f32 %v3354_v10, %v293_v2 }
 0x12b   : > { %2358 = vrcp.f32 %v1385_v12  ;;  %v881_v36 = vadd.f32 %v2940_v13, %v615_v32  ;;  %v1845_v0 = vsel %vm1723_vm1, %v1844_v6, %v1843_v29  ;;  %v1846_v37 = vperm.slane %v2351_v33, %v2975_v63  ;;  %v294_v33 = vld [vmem:[%s2800_s5 + $0x3b8] sm:$0xff] }
 0x12c   : > { %2360 = vpow2.f32 %v1190_v9  ;;  %v1008_v39 = vsub.f32 0.0, %v880_v30  ;;  %v1007_v40 = vsub.f32 0.0, %v879_v31 }
 0x12d   : > { %2362 = vrcp.f32 %v1387_v35  ;;  %v1009_v42 = vsub.f32 0.0, %v881_v36  ;;  %v1847_v46 = vsel %vm1727_vm2, %v1846_v37, %v1845_v0  ;;  %779 = vadd.xlane.f32.xlu1 %v778_v61  ;;  %776 = vadd.xlane.f32.xlu0 %v775_v4  ;;  %v279_v0 = vld [vmem:[%s2800_s5 + $0x340] sm:$0xff] }
 0x12e   : > { %v2353_v45 = vpop.eup %2352  ;;  %v1194_v48 = vmul.f32 1.442695, %v1008_v39  ;;  %v1192_v56 = vmul.f32 1.442695, %v1007_v40  ;;  %782 = vadd.xlane.f32.xlu2 %v781_v50  ;;  %v424_v50 = vmul.f32 %v3354_v10, %v292_v49  ;;  %v426_v49 = vmul.f32 %v3354_v10, %v294_v33 }
 0x12f   : > { %v2355_v52 = vpop.eup %2354  ;;  %v1389_v54 = vadd.f32 1.0, %v2353_v45  ;;  %v1196_v22 = vmul.f32 1.442695, %v1009_v42  ;;  %v745_v42 = vsel %vm435_vm0, %v410_v60, 0.0 }
 0x130   : > { %v2357_v18 = vpop.eup %2356  ;;  %2364 = vpow2.f32 %v1194_v48  ;;  %v1850_v61 = vperm.slane %v2355_v52, %v2978_v1  ;;  %v621_v51 = vpop.xlane.xlu1 %620  ;;  %v787_v43 = vsel %vm435_vm0, %v424_v50, 0.0  ;;  %v790_v48 = vsel %vm435_vm0, %v425_v24, 0.0  ;;  %v280_v52 = vld [vmem:[%s2800_s5 + $0x348] sm:$0xff] }
 0x131   : > { %v2359_v23 = vpop.eup %2358  ;;  %2366 = vrcp.f32 %v1389_v54  ;;  %v1388_v3 = vadd.f32 1.0, %v2357_v18  ;;  %v618_v4 = vpop.xlane.xlu0 %617  ;;  %v883_v9 = vadd.f32 %v2940_v13, %v621_v51  ;;  %v412_v50 = vmul.f32 %v3354_v10, %v280_v52 }
 0x132   : > { %v2361_v8 = vpop.eup %2360  ;;  %v1848_v6 = vperm.slane %v2359_v23, %v2984_v7  ;;  %2368 = vpow2.f32 %v1192_v56  ;;  %v882_v14 = vadd.f32 %v2940_v13, %v618_v4  ;;  %v624_v15 = vpop.xlane.xlu2 %623 }
 0x133   : > { %v2363_v55 = vpop.eup %2362  ;;  %2370 = vrcp.f32 %v1388_v3  ;;  %v1390_v12 = vadd.f32 1.0, %v2361_v8  ;;  %v884_v19 = vadd.f32 %v2940_v13, %v624_v15  ;;  %v1011_v29 = vsub.f32 0.0, %v883_v9 }
 0x134   : > { %v1849_v25 = vsel %vm1731_vm3, %v1848_v6, %v1847_v46  ;;  %v1852_v28 = vperm.slane %v2363_v55, %v3007_v34  ;;  %2372 = vpow2.f32 %v1196_v22  ;;  %v1010_v31 = vsub.f32 0.0, %v882_v14 }
 0x135   : > { %v1851_v30 = vsel %vm1735_vm4, %v1850_v61, %v1849_v25  ;;  %2374 = vrcp.f32 %v1390_v12  ;;  %v1012_v32 = vsub.f32 0.0, %v884_v19  ;;  %v1200_v38 = vmul.f32 1.442695, %v1011_v29  ;;  %785 = vadd.xlane.f32.xlu1 %v784_v57  ;;  %740 = vadd.xlane.f32.xlu0 %v739_v58  ;;  %v281_v12 = vld [vmem:[%s2800_s5 + $0x350] sm:$0xff] }
 0x136   : > { %v2365_v35 = vpop.eup %2364  ;;  %v1853_v36 = vsel %vm1739_vm5, %v1852_v28, %v1851_v30  ;;  %v1198_v40 = vmul.f32 1.442695, %v1010_v31  ;;  %743 = vadd.xlane.f32.xlu2 %v742_v59  ;;  %v411_v22 = vmul.f32 %v3354_v10, %v279_v0  ;;  %v295_v28 = vld [vmem:[%s2800_s5 + $0x3c0] sm:$0xff]  ;;  %v413_v0 = vmul.f32 %v3354_v10, %v281_v12 }
 0x137   : > { %v2367_v37 = vpop.eup %2366  ;;  %v1392_v39 = vadd.f32 1.0, %v2365_v35  ;;  %2376 = vpow2.f32 %v1200_v38  ;;  %v1202_v46 = vmul.f32 1.442695, %v1012_v32  ;;  %v793_v32 = vsel %vm435_vm0, %v426_v49, 0.0 }
 0x138   : > { %v2369_v45 = vpop.eup %2368  ;;  %v1856_v56 = vperm.slane %v2367_v37, %v3013_v44  ;;  %v630_v58 = vpop.xlane.xlu1 %629  ;;  %v748_v33 = vsel %vm435_vm0, %v411_v22, 0.0  ;;  %v751_v38 = vsel %vm435_vm0, %v412_v50, 0.0  ;;  %v296_v37 = vld [vmem:[%s2800_s5 + $0x3c8] sm:$0xff] }
 0x139   : > { %v2371_v54 = vpop.eup %2370  ;;  %2378 = vrcp.f32 %v1392_v39  ;;  %v1391_v57 = vadd.f32 1.0, %v2369_v45  ;;  %v627_v18 = vpop.xlane.xlu0 %626  ;;  %v886_v2 = vadd.f32 %v2940_v13, %v630_v58  ;;  %v428_v22 = vmul.f32 %v3354_v10, %v296_v37 }
 0x13a   : > { %v2373_v59 = vpop.eup %2372  ;;  %v1854_v60 = vperm.slane %v2371_v54, %v3018_v47  ;;  %2380 = vpow2.f32 %v1198_v40  ;;  %v885_v23 = vadd.f32 %v2940_v13, %v627_v18  ;;  %v633_v61 = vpop.xlane.xlu2 %632 }
 0x13b   : > { %v2375_v3 = vpop.eup %2374  ;;  %2382 = vrcp.f32 %v1391_v57  ;;  %v1393_v51 = vadd.f32 1.0, %v2373_v59  ;;  %v887_v4 = vadd.f32 %v2940_v13, %v633_v61  ;;  %v1014_v9 = vsub.f32 0.0, %v886_v2 }
 0x13c   : > { %v1855_v8 = vsel %vm1743_vm6, %v1854_v60, %v1853_v36  ;;  %v1858_v6 = vperm.slane %v2375_v3, %v3032_v5  ;;  %2384 = vpow2.f32 %v1202_v46  ;;  %v1013_v15 = vsub.f32 0.0, %v885_v23 }
 0x13d   : > { %v1857_v14 = vsel %vm1747_vm7, %v1856_v56, %v1855_v8  ;;  %2386 = vrcp.f32 %v1393_v51  ;;  %v1015_v55 = vsub.f32 0.0, %v887_v4  ;;  %v2377_v19 = vpop.eup %2376  ;;  %v1206_v25 = vmul.f32 1.442695, %v1014_v9  ;;  %746 = vadd.xlane.f32.xlu1 %v745_v42  ;;  %788 = vadd.xlane.f32.xlu0 %v787_v43  ;;  %v297_v51 = vld [vmem:[%s2800_s5 + $0x3d0] sm:$0xff] }
 0x13e   : > { %v1859_v24 = vsel %vm1751_vm8, %v1858_v6, %v1857_v14  ;;  %v1395_v30 = vadd.f32 1.0, %v2377_v19  ;;  %v1204_v31 = vmul.f32 1.442695, %v1013_v15  ;;  %791 = vadd.xlane.f32.xlu2 %v790_v48  ;;  %v427_v46 = vmul.f32 %v3354_v10, %v295_v28  ;;  %v282_v6 = vld [vmem:[%s2800_s5 + $0x358] sm:$0xff] }
 0x13f   : > { %v2379_v29 = vpop.eup %2378  ;;  %2388 = vpow2.f32 %v1206_v25  ;;  %v1208_v36 = vmul.f32 1.442695, %v1015_v55  ;;  %v754_v55 = vsel %vm435_vm0, %v413_v0, 0.0  ;;  %v799_v25 = vsel %vm435_vm0, %v428_v22, 0.0 }
 0x140   : > { %v2381_v35 = vpop.eup %2380  ;;  %v1862_v40 = vperm.slane %v2379_v29, %v3038_v16  ;;  %2390 = vrcp.f32 %v1395_v30  ;;  %v639_v43 = vpop.xlane.xlu1 %638  ;;  %v796_v12 = vsel %vm435_vm0, %v427_v46, 0.0  ;;  %v429_v28 = vmul.f32 %v3354_v10, %v297_v51  ;;  %v283_v29 = vld [vmem:[%s2800_s5 + $0x360] sm:$0xff] }
 0x141   : > { %v2383_v39 = vpop.eup %2382  ;;  %v1394_v42 = vadd.f32 1.0, %v2381_v35  ;;  %v636_v45 = vpop.xlane.xlu0 %635  ;;  %2392 = vpow2.f32 %v1204_v31  ;;  %v889_v52 = vadd.f32 %v2940_v13, %v639_v43  ;;  %v415_v46 = vmul.f32 %v3354_v10, %v283_v29 }
 0x142   : > { %v2385_v48 = vpop.eup %2384  ;;  %v1860_v49 = vperm.slane %v2383_v39, %v3041_v17  ;;  %v888_v54 = vadd.f32 %v2940_v13, %v636_v45  ;;  %v642_v56 = vpop.xlane.xlu2 %641 }
 0x143   : > { %v2387_v57 = vpop.eup %2386  ;;  %2394 = vrcp.f32 %v1394_v42  ;;  %v1396_v58 = vadd.f32 1.0, %v2385_v48  ;;  %v890_v18 = vadd.f32 %v2940_v13, %v642_v56  ;;  %v1017_v2 = vsub.f32 0.0, %v889_v52 }
 0x144   : > { %v1861_v59 = vsel %vm1755_vm9, %v1860_v49, %v1859_v24  ;;  %v1864_v60 = vperm.slane %v2387_v57, %v3048_v20  ;;  %2396 = vpow2.f32 %v1208_v36  ;;  %v1016_v61 = vsub.f32 0.0, %v888_v54 }
 0x145   : > { %v1863_v23 = vsel %vm1759_vm10, %v1862_v40, %v1861_v59  ;;  %2398 = vrcp.f32 %v1396_v58  ;;  %v1018_v3 = vsub.f32 0.0, %v890_v18  ;;  %v2389_v4 = vpop.eup %2388  ;;  %v1212_v8 = vmul.f32 1.442695, %v1017_v2  ;;  %794 = vadd.xlane.f32.xlu1 %v793_v32  ;;  %749 = vadd.xlane.f32.xlu0 %v748_v33  ;;  %v284_v58 = vld [vmem:[%s2800_s5 + $0x368] sm:$0xff] }
 0x146   : > { %v1865_v50 = vsel %vm3755_vm11, %v1864_v60, %v1863_v23  ;;  %v2391_v9 = vpop.eup %2390  ;;  %v1398_v14 = vadd.f32 1.0, %v2389_v4  ;;  %v1210_v15 = vmul.f32 1.442695, %v1016_v61  ;;  %752 = vadd.xlane.f32.xlu2 %v751_v38  ;;  %v414_v36 = vmul.f32 %v3354_v10, %v282_v6  ;;  %v298_v60 = vld [vmem:[%s2800_s5 + $0x3d8] sm:$0xff] }
 0x147   : > { %v2393_v19 = vpop.eup %2392  ;;  %2400 = vpow2.f32 %v1212_v8  ;;  %v1214_v24 = vmul.f32 1.442695, %v1018_v3  ;;  %v1868_v31 = vperm.slane %v2391_v9, %v3057_v27  ;;  %vm2002_vm11 = vcmask 1043459   ;;  %v299_v9 = vld [vmem:[%s2800_s5 + $0x3e0] sm:$0xff] }
 0x148   : > { %2402 = vrcp.f32 %v1398_v14  ;;  %v1397_v32 = vadd.f32 1.0, %v2393_v19  ;;  %v648_v33 = vpop.xlane.xlu1 %647  ;;  %v802_v3 = vsel %vm435_vm0, %v429_v28, 0.0  ;;  %v757_v51 = vsel %vm435_vm0, %v414_v36, 0.0 }
 0x149   : > { %v2395_v30 = vpop.eup %2394  ;;  %v645_v35 = vpop.xlane.xlu0 %644  ;;  %2404 = vpow2.f32 %v1210_v15  ;;  %v892_v37 = vadd.f32 %v2940_v13, %v648_v33  ;;  %v760_v8 = vsel %vm435_vm0, %v415_v46, 0.0  ;;  %v416_v6 = vmul.f32 %v3354_v10, %v284_v58 }
 0x14a   : > { %v2397_v38 = vpop.eup %2396  ;;  %v1866_v0 = vperm.slane %v2395_v30, %v3076_v62  ;;  %v891_v39 = vadd.f32 %v2940_v13, %v645_v35  ;;  %v651_v40 = vpop.xlane.xlu2 %650  ;;  %2406 = vrcp.f32 %v1397_v32  ;;  %v431_v36 = vmul.f32 %v3354_v10, %v299_v9 }
 0x14b   : > { %v2399_v42 = vpop.eup %2398  ;;  %v1399_v43 = vadd.f32 1.0, %v2397_v38  ;;  %v893_v45 = vadd.f32 %v2940_v13, %v651_v40  ;;  %2408 = vpow2.f32 %v1214_v24  ;;  %v1020_v52 = vsub.f32 0.0, %v892_v37  ;;  %v300_v40 = vld [vmem:[%s2800_s5 + $0x3e8] sm:$0xff] }
 0x14c   : > { %v1867_v48 = vsel %vm3759_vm12, %v1866_v0, %v1865_v50  ;;  %v1870_v49 = vperm.slane %v2399_v42, %v3099_v53  ;;  %v1019_v56 = vsub.f32 0.0, %v891_v39  ;;  %v430_v24 = vmul.f32 %v3354_v10, %v298_v60 }
 0x14d   : > { %v1869_v54 = vsel %vm1771_vm13, %v1868_v31, %v1867_v48  ;;  %2410 = vrcp.f32 %v1399_v43  ;;  %v1021_v57 = vsub.f32 0.0, %v893_v45  ;;  %v2401_v18 = vpop.eup %2400  ;;  %v1218_v59 = vmul.f32 1.442695, %v1020_v52  ;;  %755 = vadd.xlane.f32.xlu1 %v754_v55  ;;  %797 = vadd.xlane.f32.xlu0 %v796_v12 }
 0x14e   : > { %v1871_v22 = vsel %vm1775_vm14, %v1870_v49, %v1869_v54  ;;  %v2403_v2 = vpop.eup %2402  ;;  %v1401_v23 = vadd.f32 1.0, %v2401_v18  ;;  %v1216_v61 = vmul.f32 1.442695, %v1019_v56  ;;  %800 = vadd.xlane.f32.xlu2 %v799_v25  ;;  %v285_v49 = vld [vmem:[%s2800_s5 + $0x370] sm:$0xff]  ;;  %v805_v58 = vsel %vm435_vm0, %v430_v24, 0.0 }
 0x14f   : > { %v2405_v4 = vpop.eup %2404  ;;  %2412 = vpow2.f32 %v1218_v59  ;;  %v1220_v50 = vmul.f32 1.442695, %v1021_v57  ;;  %v1874_v15 = vperm.slane %v2403_v2, %v2958_v41  ;;  %v763_v57 = vsel %vm435_vm0, %v416_v6, 0.0  ;;  %v286_v2 = vld [vmem:[%s2800_s5 + $0x378] sm:$0xff] }
 0x150   : > { %v2407_v14 = vpop.eup %2406  ;;  %2414 = vrcp.f32 %v1401_v23  ;;  %v1400_v55 = vadd.f32 1.0, %v2405_v4  ;;  %v657_v12 = vpop.xlane.xlu1 %656  ;;  %v808_v59 = vsel %vm435_vm0, %v431_v36, 0.0  ;;  %v432_v60 = vmul.f32 %v3354_v10, %v300_v40 }
 0x151   : > { %v654_v19 = vpop.xlane.xlu0 %653  ;;  %v2409_v25 = vpop.eup %2408  ;;  %v1872_v28 = vperm.slane %v2407_v14, %v3142_v11  ;;  %2416 = vpow2.f32 %v1216_v61  ;;  %v895_v29 = vadd.f32 %v2940_v13, %v657_v12  ;;  %v417_v4 = vmul.f32 %v3354_v10, %v285_v49 }
 0x152   : > { %v894_v30 = vadd.f32 %v2940_v13, %v654_v19  ;;  %v660_v31 = vpop.xlane.xlu2 %659  ;;  %2418 = vrcp.f32 %v1400_v55  ;;  %v1402_v33 = vadd.f32 1.0, %v2409_v25  ;;  %v418_v19 = vmul.f32 %v3354_v10, %v286_v2 }
 0x153   : > { %v2411_v32 = vpop.eup %2410  ;;  %v896_v35 = vadd.f32 %v2940_v13, %v660_v31  ;;  %2420 = vpow2.f32 %v1220_v50  ;;  %v1023_v0 = vsub.f32 0.0, %v895_v29  ;;  %v1873_v42 = vsel %vm1779_vm15, %v1872_v28, %v1871_v22 }
 0x154   : > { %v1875_v38 = vperm.slane %v2411_v32, %v2993_v21  ;;  %v1022_v37 = vsub.f32 0.0, %v894_v30  ;;  %2422 = vrcp.f32 %v1402_v33  ;;  %v3464_v52 = vsel %vm2002_vm11, %v1873_v42, %v3361_v26  ;;  %vm3761_vm11 = vmmov %vm3759_vm12 }
 0x155   : > { %v1024_v39 = vsub.f32 0.0, %v896_v35  ;;  %v2413_v43 = vpop.eup %2412  ;;  %v1224_v46 = vmul.f32 1.442695, %v1023_v0  ;;  %803 = vadd.xlane.f32.xlu1 %v802_v3  ;;  %758 = vadd.xlane.f32.xlu0 %v757_v51  ;;  %v811_v40 = vsel %vm435_vm0, %v432_v60, 0.0  ;;  %v766_v42 = vsel %vm435_vm0, %v417_v4, 0.0  ;;  %v302_v4 = vld [vmem:[%s2800_s5 + $0x3f8] sm:$0xff] }
 0x156   : > { %v1876_v45 = vsel %vm1723_vm1, %v1875_v38, %v1874_v15  ;;  %v1222_v48 = vmul.f32 1.442695, %v1022_v37  ;;  %v2415_v54 = vpop.eup %2414  ;;  %v1404_v56 = vadd.f32 1.0, %v2413_v43  ;;  %761 = vadd.xlane.f32.xlu2 %v760_v8  ;;  %v301_v43 = vld [vmem:[%s2800_s5 + $0x3f0] sm:$0xff]  ;;  %vm2004_vm12 = vcmask 1044484  }
 0x157   : > { %v2417_v18 = vpop.eup %2416  ;;  %2424 = vpow2.f32 %v1224_v46  ;;  %v1226_v22 = vmul.f32 1.442695, %v1024_v39  ;;  %v1879_v61 = vperm.slane %v2415_v54, %v2984_v7 }
 0x158   : > { %v2419_v23 = vpop.eup %2418  ;;  %2426 = vrcp.f32 %v1404_v56  ;;  %v1403_v26 = vadd.f32 1.0, %v2417_v18  ;;  %v666_v3 = vpop.xlane.xlu1 %665  ;;  %v769_v56 = vsel %vm435_vm0, %v418_v19, 0.0 }
 0x159   : > { %v663_v51 = vpop.xlane.xlu0 %662  ;;  %v2421_v50 = vpop.eup %2420  ;;  %v1877_v8 = vperm.slane %v2419_v23, %v2975_v63  ;;  %2428 = vpow2.f32 %v1222_v48  ;;  %v898_v6 = vadd.f32 %v2940_v13, %v666_v3 }
 0x15a   : > { %v897_v9 = vadd.f32 %v2940_v13, %v663_v51  ;;  %v669_v14 = vpop.xlane.xlu2 %668  ;;  %v2423_v15 = vpop.eup %2422  ;;  %2430 = vrcp.f32 %v1403_v26  ;;  %v1405_v55 = vadd.f32 1.0, %v2421_v50 }
 0x15b   : > { %v899_v12 = vadd.f32 %v2940_v13, %v669_v14  ;;  %v1878_v24 = vsel %vm1727_vm2, %v1877_v8, %v1876_v45  ;;  %v1881_v25 = vperm.slane %v2423_v15, %v2978_v1  ;;  %2432 = vpow2.f32 %v1226_v22 }
 0x15c   : > { %v1026_v28 = vsub.f32 0.0, %v898_v6  ;;  %v1880_v29 = vsel %vm1731_vm3, %v1879_v61, %v1878_v24  ;;  %2434 = vrcp.f32 %v1405_v55  ;;  %v1025_v30 = vsub.f32 0.0, %v897_v9 }
 0x15d   : > { %v1027_v31 = vsub.f32 0.0, %v899_v12  ;;  %v2425_v32 = vpop.eup %2424  ;;  %v1882_v33 = vsel %vm1735_vm4, %v1881_v25, %v1880_v29  ;;  %764 = vadd.xlane.f32.xlu1 %v763_v57  ;;  %806 = vadd.xlane.f32.xlu0 %v805_v58  ;;  %v433_v61 = vmul.f32 %v3354_v10, %v301_v43  ;;  %v434_v24 = vmul.f32 %v3354_v10, %v302_v4 }
 0x15e   : > { %v1230_v35 = vmul.f32 1.442695, %v1026_v28  ;;  %v2427_v36 = vpop.eup %2426  ;;  %v1407_v38 = vadd.f32 1.0, %v2425_v32  ;;  %v1228_v0 = vmul.f32 1.442695, %v1025_v30  ;;  %809 = vadd.xlane.f32.xlu2 %v808_v59 }
 0x15f   : > { %v2429_v37 = vpop.eup %2428  ;;  %v1232_v39 = vmul.f32 1.442695, %v1027_v31  ;;  %v1885_v46 = vperm.slane %v2427_v36, %v3018_v47  ;;  %v817_v43 = vsel %vm435_vm0, %v434_v24, 0.0 }
 0x160   : > { %2436 = vpow2.f32 %v1230_v35  ;;  %v2431_v45 = vpop.eup %2430  ;;  %v1406_v48 = vadd.f32 1.0, %v2429_v37  ;;  %v675_v49 = vpop.xlane.xlu1 %674  ;;  %v814_v35 = vsel %vm435_vm0, %v433_v61, 0.0  ;;  %vm3760_vm0 = vcmask 786112  }
 0x161   : > { %2438 = vrcp.f32 %v1407_v38  ;;  %v672_v54 = vpop.xlane.xlu0 %671  ;;  %v2433_v57 = vpop.eup %2432  ;;  %v1883_v58 = vperm.slane %v2431_v45, %v3007_v34  ;;  %v901_v18 = vadd.f32 %v2940_v13, %v675_v49 }
 0x162   : > { %2440 = vpow2.f32 %v1228_v0  ;;  %v900_v22 = vadd.f32 %v2940_v13, %v672_v54  ;;  %v678_v59 = vpop.xlane.xlu2 %677  ;;  %v2435_v60 = vpop.eup %2434  ;;  %v1408_v2 = vadd.f32 1.0, %v2433_v57 }
 0x163   : > { %2442 = vrcp.f32 %v1406_v48  ;;  %v902_v23 = vadd.f32 %v2940_v13, %v678_v59  ;;  %v1884_v26 = vsel %vm1739_vm5, %v1883_v58, %v1882_v33  ;;  %v1887_v3 = vperm.slane %v2435_v60, %v3013_v44 }
 0x164   : > { %2444 = vpow2.f32 %v1232_v39  ;;  %v1029_v51 = vsub.f32 0.0, %v901_v18  ;;  %v1886_v50 = vsel %vm1743_vm6, %v1885_v46, %v1884_v26  ;;  %v1028_v8 = vsub.f32 0.0, %v900_v22 }
 0x165   : > { %2446 = vrcp.f32 %v1408_v2  ;;  %v1030_v6 = vsub.f32 0.0, %v902_v23  ;;  %v1888_v14 = vsel %vm1747_vm7, %v1887_v3, %v1886_v50  ;;  %812 = vadd.xlane.f32.xlu1 %v811_v40  ;;  %767 = vadd.xlane.f32.xlu0 %v766_v42 }
 0x166   : > { %v2437_v9 = vpop.eup %2436  ;;  %v1236_v15 = vmul.f32 1.442695, %v1029_v51  ;;  %v1234_v19 = vmul.f32 1.442695, %v1028_v8  ;;  %770 = vadd.xlane.f32.xlu2 %v769_v56 }
 0x167   : > { %v2439_v55 = vpop.eup %2438  ;;  %v1410_v12 = vadd.f32 1.0, %v2437_v9  ;;  %v1238_v28 = vmul.f32 1.442695, %v1030_v6 }
 0x168   : > { %v2441_v25 = vpop.eup %2440  ;;  %2448 = vpow2.f32 %v1236_v15  ;;  %v1891_v30 = vperm.slane %v2439_v55, %v3041_v17  ;;  %v684_v32 = vpop.xlane.xlu1 %683 }
 0x169   : > { %v2443_v29 = vpop.eup %2442  ;;  %2450 = vrcp.f32 %v1410_v12  ;;  %v1409_v31 = vadd.f32 1.0, %v2441_v25  ;;  %v681_v33 = vpop.xlane.xlu0 %680  ;;  %v904_v0 = vadd.f32 %v2940_v13, %v684_v32 }
 0x16a   : > { %v2445_v36 = vpop.eup %2444  ;;  %v1889_v38 = vperm.slane %v2443_v29, %v3032_v5  ;;  %2452 = vpow2.f32 %v1234_v19  ;;  %v903_v10 = vadd.f32 %v2940_v13, %v681_v33  ;;  %v687_v37 = vpop.xlane.xlu2 %686 }
 0x16b   : > { %v2447_v39 = vpop.eup %2446  ;;  %2454 = vrcp.f32 %v1409_v31  ;;  %v1411_v40 = vadd.f32 1.0, %v2445_v36  ;;  %v905_v42 = vadd.f32 %v2940_v13, %v687_v37  ;;  %v1032_v48 = vsub.f32 0.0, %v904_v0 }
 0x16c   : > { %v1890_v45 = vsel %vm1751_vm8, %v1889_v38, %v1888_v14  ;;  %v1893_v46 = vperm.slane %v2447_v39, %v3038_v16  ;;  %2456 = vpow2.f32 %v1238_v28  ;;  %v1031_v54 = vsub.f32 0.0, %v903_v10 }
 0x16d   : > { %v1892_v49 = vsel %vm1755_vm9, %v1891_v30, %v1890_v45  ;;  %2458 = vrcp.f32 %v1411_v40  ;;  %v1033_v56 = vsub.f32 0.0, %v905_v42  ;;  %v1242_v18 = vmul.f32 1.442695, %v1032_v48  ;;  %815 = vadd.xlane.f32.xlu0 %v814_v35  ;;  %818 = vadd.xlane.f32.xlu1 %v817_v43 }
 0x16e   : > { %v2449_v57 = vpop.eup %2448  ;;  %v1894_v58 = vsel %vm1759_vm10, %v1893_v46, %v1892_v49  ;;  %v1240_v60 = vmul.f32 1.442695, %v1031_v54 }
 0x16f   : > { %v2451_v22 = vpop.eup %2450  ;;  %v1413_v59 = vadd.f32 1.0, %v2449_v57  ;;  %2460 = vpow2.f32 %v1242_v18  ;;  %v1244_v23 = vmul.f32 1.442695, %v1033_v56 }
 0x170   : > { %v2453_v2 = vpop.eup %2452  ;;  %v1897_v26 = vperm.slane %v2451_v22, %v3076_v62  ;;  %v693_v51 = vpop.xlane.xlu1 %692 }
 0x171   : > { %v2455_v61 = vpop.eup %2454  ;;  %2462 = vrcp.f32 %v1413_v59  ;;  %v1412_v3 = vadd.f32 1.0, %v2453_v2  ;;  %v690_v4 = vpop.xlane.xlu0 %689  ;;  %v907_v6 = vadd.f32 %v2940_v13, %v693_v51 }
 0x172   : > { %v2457_v50 = vpop.eup %2456  ;;  %v1895_v8 = vperm.slane %v2455_v61, %v3048_v20  ;;  %2464 = vpow2.f32 %v1240_v60  ;;  %v906_v9 = vadd.f32 %v2940_v13, %v690_v4  ;;  %v696_v14 = vpop.xlane.xlu2 %695 }
 0x173   : > { %v2459_v15 = vpop.eup %2458  ;;  %2466 = vrcp.f32 %v1412_v3  ;;  %v1414_v55 = vadd.f32 1.0, %v2457_v50  ;;  %v908_v12 = vadd.f32 %v2940_v13, %v696_v14  ;;  %v1035_v25 = vsub.f32 0.0, %v907_v6 }
 0x174   : > { %v1896_v19 = vsel %vm3760_vm0, %v1895_v8, %v1894_v58  ;;  %v1899_v24 = vperm.slane %v2459_v15, %v3057_v27  ;;  %2468 = vpow2.f32 %v1244_v23  ;;  %v1034_v29 = vsub.f32 0.0, %v906_v9 }
 0x175   : > { %v1898_v28 = vsel %vm3761_vm11, %v1897_v26, %v1896_v19  ;;  %v1036_v30 = vsub.f32 0.0, %v908_v12  ;;  %v2461_v31 = vpop.eup %2460  ;;  %v1248_v33 = vmul.f32 1.442695, %v1035_v25  ;;  %2470 = vrcp.f32 %v1414_v55 }
 0x176   : > { %v1900_v32 = vsel %vm1771_vm13, %v1899_v24, %v1898_v28  ;;  %v1416_v36 = vadd.f32 1.0, %v2461_v31  ;;  %v1246_v38 = vmul.f32 1.442695, %v1034_v29 }
 0x177   : > { %v2463_v35 = vpop.eup %2462  ;;  %2472 = vpow2.f32 %v1248_v33  ;;  %v1250_v10 = vmul.f32 1.442695, %v1036_v30 }
 0x178   : > { %v2465_v0 = vpop.eup %2464  ;;  %v1903_v39 = vperm.slane %v2463_v35, %v3142_v11  ;;  %2474 = vrcp.f32 %v1416_v36  ;;  %v702_v42 = vpop.xlane.xlu1 %701 }
 0x179   : > { %v2467_v37 = vpop.eup %2466  ;;  %v1415_v40 = vadd.f32 1.0, %v2465_v0  ;;  %v699_v43 = vpop.xlane.xlu0 %698  ;;  %2476 = vpow2.f32 %v1246_v38  ;;  %v910_v48 = vadd.f32 %v2940_v13, %v702_v42 }
 0x17a   : > { %v2469_v45 = vpop.eup %2468  ;;  %v1901_v46 = vperm.slane %v2467_v37, %v3099_v53  ;;  %v909_v49 = vadd.f32 %v2940_v13, %v699_v43  ;;  %v705_v54 = vpop.xlane.xlu2 %704 }
 0x17b   : > { %2478 = vrcp.f32 %v1415_v40  ;;  %v1417_v56 = vadd.f32 1.0, %v2469_v45  ;;  %v911_v57 = vadd.f32 %v2940_v13, %v705_v54  ;;  %v1038_v58 = vsub.f32 0.0, %v910_v48  ;;  %v2471_v22 = vpop.eup %2470 }
 0x17c   : > { %2480 = vpow2.f32 %v1250_v10  ;;  %v1037_v18 = vsub.f32 0.0, %v909_v49  ;;  %v1902_v60 = vsel %vm1775_vm14, %v1901_v46, %v1900_v32  ;;  %v1905_v8 = vperm.slane %v2471_v22, %v2958_v41 }
 0x17d   : > { %2482 = vrcp.f32 %v1417_v56  ;;  %v1039_v59 = vsub.f32 0.0, %v911_v57  ;;  %v2473_v2 = vpop.eup %2472  ;;  %v1254_v23 = vmul.f32 1.442695, %v1038_v58  ;;  %v1904_v26 = vsel %vm1779_vm15, %v1903_v39, %v1902_v60 }
 0x17e   : > { %v1252_v61 = vmul.f32 1.442695, %v1037_v18  ;;  %v2475_v3 = vpop.eup %2474  ;;  %v1419_v51 = vadd.f32 1.0, %v2473_v2  ;;  %v3526_v4 = vsel %vm2004_vm12, %v1904_v26, %v3464_v52  ;;  %vm2006_vm12 = vcmask 1045509  }
 0x17f   : > { %v2477_v50 = vpop.eup %2476  ;;  %2484 = vpow2.f32 %v1254_v23  ;;  %v1256_v6 = vmul.f32 1.442695, %v1039_v59  ;;  %v1908_v14 = vperm.slane %v2475_v3, %v2975_v63 }
 0x180   : > { %2486 = vrcp.f32 %v1419_v51  ;;  %v1418_v15 = vadd.f32 1.0, %v2477_v50  ;;  %v711_v55 = vpop.xlane.xlu1 %710 }
 0x181   : > { %v2479_v9 = vpop.eup %2478  ;;  %v708_v12 = vpop.xlane.xlu0 %707  ;;  %2488 = vpow2.f32 %v1252_v61  ;;  %v913_v25 = vadd.f32 %v2940_v13, %v711_v55 }
 0x182   : > { %v2481_v19 = vpop.eup %2480  ;;  %v1906_v24 = vperm.slane %v2479_v9, %v2993_v21  ;;  %v912_v52 = vadd.f32 %v2940_v13, %v708_v12  ;;  %v714_v28 = vpop.xlane.xlu2 %713  ;;  %2490 = vrcp.f32 %v1418_v15 }
 0x183   : > { %v2483_v29 = vpop.eup %2482  ;;  %v1420_v30 = vadd.f32 1.0, %v2481_v19  ;;  %v914_v31 = vadd.f32 %v2940_v13, %v714_v28  ;;  %2492 = vpow2.f32 %v1256_v6  ;;  %v1041_v35 = vsub.f32 0.0, %v913_v25 }
 0x184   : > { %v1907_v32 = vsel %vm1723_vm1, %v1906_v24, %v1905_v8  ;;  %v1910_v33 = vperm.slane %v2483_v29, %v2984_v7  ;;  %v1040_v38 = vsub.f32 0.0, %v912_v52 }
 0x185   : > { %v1909_v36 = vsel %vm1727_vm2, %v1908_v14, %v1907_v32  ;;  %2494 = vrcp.f32 %v1420_v30  ;;  %v1042_v0 = vsub.f32 0.0, %v914_v31  ;;  %v2485_v10 = vpop.eup %2484  ;;  %v1260_v39 = vmul.f32 1.442695, %v1041_v35 }
 0x186   : > { %v1911_v37 = vsel %vm1731_vm3, %v1910_v33, %v1909_v36  ;;  %v2487_v40 = vpop.eup %2486  ;;  %v1422_v42 = vadd.f32 1.0, %v2485_v10  ;;  %v1258_v43 = vmul.f32 1.442695, %v1040_v38 }
 0x187   : > { %v2489_v45 = vpop.eup %2488  ;;  %2496 = vpow2.f32 %v1260_v39  ;;  %v1262_v46 = vmul.f32 1.442695, %v1042_v0  ;;  %v1914_v49 = vperm.slane %v2487_v40, %v3007_v34 }
 0x188   : > { %v2491_v48 = vpop.eup %2490  ;;  %2498 = vrcp.f32 %v1422_v42  ;;  %v1421_v54 = vadd.f32 1.0, %v2489_v45  ;;  %v720_v56 = vpop.xlane.xlu1 %719 }
 0x189   : > { %v717_v57 = vpop.xlane.xlu0 %716  ;;  %v2493_v58 = vpop.eup %2492  ;;  %v1912_v18 = vperm.slane %v2491_v48, %v2978_v1  ;;  %2500 = vpow2.f32 %v1258_v43  ;;  %v916_v22 = vadd.f32 %v2940_v13, %v720_v56 }
 0x18a   : > { %v915_v59 = vadd.f32 %v2940_v13, %v717_v57  ;;  %v723_v60 = vpop.xlane.xlu2 %722  ;;  %2502 = vrcp.f32 %v1421_v54  ;;  %v1423_v23 = vadd.f32 1.0, %v2493_v58 }
 0x18b   : > { %v2495_v2 = vpop.eup %2494  ;;  %v917_v61 = vadd.f32 %v2940_v13, %v723_v60  ;;  %v1913_v26 = vsel %vm1735_vm4, %v1912_v18, %v1911_v37  ;;  %2504 = vpow2.f32 %v1262_v46  ;;  %v1044_v51 = vsub.f32 0.0, %v916_v22 }
 0x18c   : > { %v1916_v3 = vperm.slane %v2495_v2, %v3018_v47  ;;  %v1915_v50 = vsel %vm1739_vm5, %v1914_v49, %v1913_v26  ;;  %2506 = vrcp.f32 %v1423_v23  ;;  %v1043_v8 = vsub.f32 0.0, %v915_v59 }
 0x18d   : > { %v1045_v6 = vsub.f32 0.0, %v917_v61  ;;  %v2497_v9 = vpop.eup %2496  ;;  %v1266_v15 = vmul.f32 1.442695, %v1044_v51 }
 0x18e   : > { %v1917_v14 = vsel %vm1743_vm6, %v1916_v3, %v1915_v50  ;;  %v2499_v55 = vpop.eup %2498  ;;  %v1425_v12 = vadd.f32 1.0, %v2497_v9  ;;  %v1264_v19 = vmul.f32 1.442695, %v1043_v8 }
 0x18f   : > { %v2501_v24 = vpop.eup %2500  ;;  %2508 = vpow2.f32 %v1266_v15  ;;  %v1268_v25 = vmul.f32 1.442695, %v1045_v6  ;;  %v1920_v28 = vperm.slane %v2499_v55, %v3032_v5 }
 0x190   : > { %v2503_v52 = vpop.eup %2502  ;;  %2510 = vrcp.f32 %v1425_v12  ;;  %v1424_v29 = vadd.f32 1.0, %v2501_v24  ;;  %v729_v30 = vpop.xlane.xlu1 %728 }
 0x191   : > { %v726_v31 = vpop.xlane.xlu0 %725  ;;  %v2505_v32 = vpop.eup %2504  ;;  %v1918_v33 = vperm.slane %v2503_v52, %v3013_v44  ;;  %2512 = vpow2.f32 %v1264_v19  ;;  %v919_v35 = vadd.f32 %v2940_v13, %v729_v30 }
 0x192   : > { %v918_v36 = vadd.f32 %v2940_v13, %v726_v31  ;;  %v732_v38 = vpop.xlane.xlu2 %731  ;;  %v2507_v0 = vpop.eup %2506  ;;  %2514 = vrcp.f32 %v1424_v29  ;;  %v1426_v10 = vadd.f32 1.0, %v2505_v32 }
 0x193   : > { %v1919_v37 = vsel %vm1747_vm7, %v1918_v33, %v1917_v14  ;;  %v1922_v39 = vperm.slane %v2507_v0, %v3041_v17  ;;  %2516 = vpow2.f32 %v1268_v25  ;;  %v1047_v40 = vsub.f32 0.0, %v919_v35 }
 0x194   : > { %v1921_v42 = vsel %vm1751_vm8, %v1920_v28, %v1919_v37  ;;  %2518 = vrcp.f32 %v1426_v10  ;;  %v1046_v43 = vsub.f32 0.0, %v918_v36  ;;  %v920_v29 = vadd.f32 %v2940_v13, %v732_v38 }
 0x195   : > { %v2509_v45 = vpop.eup %2508  ;;  %v1923_v46 = vsel %vm1755_vm9, %v1922_v39, %v1921_v42  ;;  %v1272_v48 = vmul.f32 1.442695, %v1047_v40 }
 0x196   : > { %v2511_v49 = vpop.eup %2510  ;;  %v1428_v54 = vadd.f32 1.0, %v2509_v45  ;;  %v1270_v56 = vmul.f32 1.442695, %v1046_v43  ;;  %v1048_v36 = vsub.f32 0.0, %v920_v29 }
 0x197   : > { %v2513_v57 = vpop.eup %2512  ;;  %2520 = vpow2.f32 %v1272_v48  ;;  %v1926_v18 = vperm.slane %v2511_v49, %v3048_v20 }
 0x198   : > { %v2515_v58 = vpop.eup %2514  ;;  %2522 = vrcp.f32 %v1428_v54  ;;  %v1427_v22 = vadd.f32 1.0, %v2513_v57  ;;  %v738_v59 = vpop.xlane.xlu1 %737  ;;  %v1274_v49 = vmul.f32 1.442695, %v1048_v36 }
 0x199   : > { %v735_v60 = vpop.xlane.xlu0 %734  ;;  %v2517_v2 = vpop.eup %2516  ;;  %v1924_v23 = vperm.slane %v2515_v58, %v3038_v16  ;;  %2524 = vpow2.f32 %v1270_v56  ;;  %v922_v33 = vadd.f32 %v2940_v13, %v738_v59 }
 0x19a   : > { %v774_v61 = vpop.xlane.xlu2 %773  ;;  %v2519_v26 = vpop.eup %2518  ;;  %2526 = vrcp.f32 %v1427_v22  ;;  %v1429_v3 = vadd.f32 1.0, %v2517_v2  ;;  %v921_v38 = vadd.f32 %v2940_v13, %v735_v60 }
 0x19b   : > { %v1925_v51 = vsel %vm1759_vm10, %v1924_v23, %v1923_v46  ;;  %v1928_v50 = vperm.slane %v2519_v26, %v3076_v62  ;;  %v1050_v40 = vsub.f32 0.0, %v922_v33  ;;  %v934_v54 = vadd.f32 %v2940_v13, %v774_v61 }
 0x19c   : > { %v1927_v8 = vsel %vm3760_vm0, %v1926_v18, %v1925_v51  ;;  %2528 = vrcp.f32 %v1429_v3  ;;  %v1049_v22 = vsub.f32 0.0, %v921_v38 }
 0x19d   : > { %v2521_v6 = vpop.eup %2520  ;;  %v1929_v9 = vsel %vm3761_vm11, %v1928_v50, %v1927_v8  ;;  %v1278_v18 = vmul.f32 1.442695, %v1050_v40 }
 0x19e   : > { %v2523_v14 = vpop.eup %2522  ;;  %v1431_v15 = vadd.f32 1.0, %v2521_v6  ;;  %v1276_v23 = vmul.f32 1.442695, %v1049_v22 }
 0x19f   : > { %v2525_v55 = vpop.eup %2524  ;;  %v1932_v52 = vperm.slane %v2523_v14, %v3099_v53 }
 0x1a0   : > { %v2527_v12 = vpop.eup %2526  ;;  %2530 = vrcp.f32 %v1431_v15  ;;  %v1430_v19 = vadd.f32 1.0, %v2525_v55  ;;  %v780_v24 = vpop.xlane.xlu1 %779 }
 0x1a1   : > { %v777_v25 = vpop.xlane.xlu0 %776  ;;  %v1930_v28 = vperm.slane %v2527_v12, %v3057_v27  ;;  %v936_v57 = vadd.f32 %v2940_v13, %v780_v24 }
 0x1a2   : > { %v783_v30 = vpop.xlane.xlu2 %782  ;;  %v2529_v31 = vpop.eup %2528  ;;  %2532 = vrcp.f32 %v1430_v19  ;;  %v935_v59 = vadd.f32 %v2940_v13, %v777_v25 }
 0x1a3   : > { %v1934_v32 = vperm.slane %v2529_v31, %v3142_v11  ;;  %v1931_v35 = vsel %vm1771_vm13, %v1930_v28, %v1929_v9  ;;  %2534 = vpow2.f32 %v1274_v49  ;;  %v937_v60 = vadd.f32 %v2940_v13, %v783_v30 }
 0x1a4   : > { %v1933_v0 = vsel %vm1775_vm14, %v1932_v52, %v1931_v35  ;;  %v1064_v2 = vsub.f32 0.0, %v936_v57  ;;  %2536 = vpow2.f32 %v1278_v18  ;;  %v1063_v26 = vsub.f32 0.0, %v935_v59 }
 0x1a5   : > { %v1935_v37 = vsel %vm1779_vm15, %v1934_v32, %v1933_v0  ;;  %v1065_v8 = vsub.f32 0.0, %v937_v60  ;;  %2538 = vpow2.f32 %v1276_v23 }
 0x1a6   : > { %v2531_v10 = vpop.eup %2530  ;;  %v3572_v42 = vsel %vm2006_vm12, %v1935_v37, %v3526_v4  ;;  %v1062_v4 = vsub.f32 0.0, %v934_v54  ;;  %v1306_v14 = vmul.f32 1.442695, %v1064_v2  ;;  %v1304_v12 = vmul.f32 1.442695, %v1063_v26 }
 0x1a7   : > { %v1937_v39 = vperm.slane %v2531_v10, %v2993_v21  ;;  %v1308_v52 = vmul.f32 1.442695, %v1065_v8 }
 0x1a8   : > { %v2533_v43 = vpop.eup %2532  ;;  %v786_v45 = vpop.xlane.xlu1 %785  ;;  %v1302_v50 = vmul.f32 1.442695, %v1062_v4 }
 0x1a9   : > { %v741_v46 = vpop.xlane.xlu0 %740  ;;  %v1936_v48 = vperm.slane %v2533_v43, %v2958_v41  ;;  %v938_v61 = vadd.f32 %v2940_v13, %v786_v45  ;;  %v2535_v55 = vpop.eup %2534 }
 0x1aa   : > { %v744_v56 = vpop.xlane.xlu2 %743  ;;  %v923_v6 = vadd.f32 %v2940_v13, %v741_v46  ;;  %v2537_v25 = vpop.eup %2536  ;;  %2540 = vpow2.f32 %v1302_v50  ;;  %v1432_v30 = vadd.f32 1.0, %v2535_v55 }
 0x1ab   : > { %v3578_v58 = vsel %vm1723_vm1, %v1937_v39, %v1936_v48  ;;  %v924_v15 = vadd.f32 %v2940_v13, %v744_v56  ;;  %v1066_v19 = vsub.f32 0.0, %v938_v61  ;;  %2542 = vpow2.f32 %v1306_v14  ;;  %v2539_v10 = vpop.eup %2538 }
 0x1ac   : > { %v1051_v28 = vsub.f32 0.0, %v923_v6  ;;  %2544 = vpow2.f32 %v1304_v12  ;;  %v1434_v35 = vadd.f32 1.0, %v2537_v25  ;;  %v1433_v54 = vadd.f32 1.0, %v2539_v10 }
 0x1ad   : > { %v1052_v31 = vsub.f32 0.0, %v924_v15  ;;  %v1310_v32 = vmul.f32 1.442695, %v1066_v19  ;;  %2546 = vpow2.f32 %v1308_v52 }
 0x1ae   : > { %v1280_v37 = vmul.f32 1.442695, %v1051_v28  ;;  %2548 = vrcp.f32 %v1432_v30 }
 0x1af   : > { %v1282_v43 = vmul.f32 1.442695, %v1052_v31  ;;  %2550 = vpow2.f32 %v1310_v32 }
 0x1b0   : > { %v747_v3 = vpop.xlane.xlu1 %746  ;;  %v2541_v45 = vpop.eup %2540  ;;  %2552 = vrcp.f32 %v1434_v35 }
 0x1b1   : > { %v789_v51 = vpop.xlane.xlu0 %788  ;;  %v925_v24 = vadd.f32 %v2940_v13, %v747_v3  ;;  %v2543_v49 = vpop.eup %2542  ;;  %2554 = vpow2.f32 %v1280_v37  ;;  %v1446_v59 = vadd.f32 1.0, %v2541_v45 }
 0x1b2   : > { %v792_v9 = vpop.xlane.xlu2 %791  ;;  %v939_v29 = vadd.f32 %v2940_v13, %v789_v51  ;;  %v2545_v56 = vpop.eup %2544  ;;  %2556 = vpow2.f32 %v1282_v43  ;;  %v1448_v60 = vadd.f32 1.0, %v2543_v49 }
 0x1b3   : > { %v1053_v33 = vsub.f32 0.0, %v925_v24  ;;  %v940_v40 = vadd.f32 %v2940_v13, %v792_v9  ;;  %v2547_v4 = vpop.eup %2546  ;;  %v1447_v26 = vadd.f32 1.0, %v2545_v56 }
 0x1b4   : > { %v1067_v39 = vsub.f32 0.0, %v939_v29  ;;  %v3590_v23 = vpop.eup %2548  ;;  %v1449_v15 = vadd.f32 1.0, %v2547_v4 }
 0x1b5   : > { %v1284_v46 = vmul.f32 1.442695, %v1053_v33  ;;  %v1068_v18 = vsub.f32 0.0, %v940_v40  ;;  %v2551_v51 = vpop.eup %2550 }
 0x1b6   : > { %v1312_v57 = vmul.f32 1.442695, %v1067_v39  ;;  %v3593_v14 = vpop.eup %2552  ;;  %v1450_v25 = vadd.f32 1.0, %v2551_v51 }
 0x1b7   : > { %2558 = vpow2.f32 %v1284_v46  ;;  %v1314_v50 = vmul.f32 1.442695, %v1068_v18  ;;  %v2555_v55 = vpop.eup %2554 }
 0x1b8   : > { %v795_v36 = vpop.xlane.xlu1 %794  ;;  %2560 = vrcp.f32 %v1433_v54  ;;  %v2557_v24 = vpop.eup %2556  ;;  %v1435_v33 = vadd.f32 1.0, %v2555_v55 }
 0x1b9   : > { %v750_v0 = vpop.xlane.xlu0 %749  ;;  %v941_v48 = vadd.f32 %v2940_v13, %v795_v36  ;;  %2562 = vpow2.f32 %v1312_v57  ;;  %v1436_v36 = vadd.f32 1.0, %v2557_v24 }
 0x1ba   : > { %v753_v38 = vpop.xlane.xlu2 %752  ;;  %v926_v22 = vadd.f32 %v2940_v13, %v750_v0  ;;  %2564 = vrcp.f32 %v1446_v59 }
 0x1bb   : > { %v1069_v2 = vsub.f32 0.0, %v941_v48  ;;  %v927_v6 = vadd.f32 %v2940_v13, %v753_v38  ;;  %2566 = vrcp.f32 %v1448_v60 }
 0x1bc   : > { %v1054_v8 = vsub.f32 0.0, %v926_v22  ;;  %2568 = vrcp.f32 %v1447_v26 }
 0x1bd   : > { %v1316_v12 = vmul.f32 1.442695, %v1069_v2  ;;  %v2559_v28 = vpop.eup %2558  ;;  %2570 = vpow2.f32 %v1314_v50  ;;  %v1055_v30 = vsub.f32 0.0, %v927_v6 }
 0x1be   : > { %v1286_v29 = vmul.f32 1.442695, %v1054_v8  ;;  %v3598_v32 = vpop.eup %2560  ;;  %2572 = vrcp.f32 %v1449_v15  ;;  %v1437_v37 = vadd.f32 1.0, %v2559_v28 }
 0x1bf   : > { %v2563_v35 = vpop.eup %2562  ;;  %2574 = vpow2.f32 %v1316_v12  ;;  %v1288_v45 = vmul.f32 1.442695, %v1055_v30 }
 0x1c0   : > { %v756_v61 = vpop.xlane.xlu1 %755  ;;  %v3600_v10 = vpop.eup %2564  ;;  %2576 = vrcp.f32 %v1450_v25  ;;  %v1451_v56 = vadd.f32 1.0, %v2563_v35 }
 0x1c1   : > { %v798_v3 = vpop.xlane.xlu0 %797  ;;  %v928_v19 = vadd.f32 %v2940_v13, %v756_v61  ;;  %v3602_v43 = vpop.eup %2566  ;;  %2578 = vpow2.f32 %v1286_v29 }
 0x1c2   : > { %v801_v9 = vpop.xlane.xlu2 %800  ;;  %v942_v52 = vadd.f32 %v2940_v13, %v798_v3  ;;  %v3605_v54 = vpop.eup %2568  ;;  %2580 = vrcp.f32 %v1435_v33 }
 0x1c3   : > { %v943_v31 = vadd.f32 %v2940_v13, %v801_v9  ;;  %v1056_v0 = vsub.f32 0.0, %v928_v19  ;;  %v2571_v18 = vpop.eup %2570  ;;  %2582 = vrcp.f32 %v1436_v36  ;;  %v1939_v36 = vperm.slane %v3590_v23, %v2975_v63 }
 0x1c4   : > { %v1070_v39 = vsub.f32 0.0, %v942_v52  ;;  %v3609_v4 = vpop.eup %2572  ;;  %2584 = vrcp.f32 %v1437_v37  ;;  %v1452_v50 = vadd.f32 1.0, %v2571_v18  ;;  %v1941_v23 = vperm.slane %v3598_v32, %v2984_v7 }
 0x1c5   : > { %v1071_v46 = vsub.f32 0.0, %v943_v31  ;;  %v1290_v22 = vmul.f32 1.442695, %v1056_v0  ;;  %v2575_v26 = vpop.eup %2574  ;;  %2586 = vpow2.f32 %v1288_v45  ;;  %v1940_v18 = vsel %vm1727_vm2, %v1939_v36, %v3578_v58 }
 0x1c6   : > { %v1318_v60 = vmul.f32 1.442695, %v1070_v39  ;;  %v3611_v51 = vpop.eup %2576  ;;  %2588 = vrcp.f32 %v1451_v56  ;;  %v1453_v55 = vadd.f32 1.0, %v2575_v26  ;;  %v1968_v58 = vperm.slane %v3605_v54, %v2993_v21 }
 0x1c7   : > { %v1320_v61 = vmul.f32 1.442695, %v1071_v46  ;;  %v2579_v8 = vpop.eup %2578  ;;  %2590 = vpow2.f32 %v1290_v22 }
 0x1c8   : > { %v804_v40 = vpop.xlane.xlu1 %803  ;;  %v3613_v15 = vpop.eup %2580  ;;  %2592 = vpow2.f32 %v1318_v60  ;;  %v1438_v30 = vadd.f32 1.0, %v2579_v8  ;;  %v1943_v60 = vperm.slane %v3593_v14, %v2978_v1 }
 0x1c9   : > { %v759_v38 = vpop.xlane.xlu0 %758  ;;  %v944_v48 = vadd.f32 %v2940_v13, %v804_v40  ;;  %v3615_v24 = vpop.eup %2582  ;;  %2594 = vpow2.f32 %v1320_v61 }
 0x1ca   : > { %v762_v49 = vpop.xlane.xlu2 %761  ;;  %v929_v57 = vadd.f32 %v2940_v13, %v759_v38  ;;  %v3618_v29 = vpop.eup %2584  ;;  %2596 = vrcp.f32 %v1452_v50 }
 0x1cb   : > { %v930_v59 = vadd.f32 %v2940_v13, %v762_v49  ;;  %v1072_v3 = vsub.f32 0.0, %v944_v48  ;;  %v2587_v35 = vpop.eup %2586 }
 0x1cc   : > { %v1057_v2 = vsub.f32 0.0, %v929_v57  ;;  %v3624_v39 = vpop.eup %2588  ;;  %v1439_v49 = vadd.f32 1.0, %v2587_v35 }
 0x1cd   : > { %v1058_v9 = vsub.f32 0.0, %v930_v59  ;;  %v1322_v25 = vmul.f32 1.442695, %v1072_v3  ;;  %v2591_v45 = vpop.eup %2590 }
 0x1ce   : > { %v1292_v6 = vmul.f32 1.442695, %v1057_v2  ;;  %v2593_v48 = vpop.eup %2592  ;;  %v1967_v2 = vperm.slane %v3600_v10, %v2958_v41  ;;  %v1440_v26 = vadd.f32 1.0, %v2591_v45 }
 0x1cf   : > { %v1294_v0 = vmul.f32 1.442695, %v1058_v9  ;;  %v2595_v57 = vpop.eup %2594  ;;  %v1454_v8 = vadd.f32 1.0, %v2593_v48 }
 0x1d0   : > { %v765_v12 = vpop.xlane.xlu1 %764  ;;  %2598 = vpow2.f32 %v1292_v6  ;;  %v3630_v59 = vpop.eup %2596  ;;  %v1455_v14 = vadd.f32 1.0, %v2595_v57 }
 0x1d1   : > { %v807_v19 = vpop.xlane.xlu0 %806  ;;  %v931_v52 = vadd.f32 %v2940_v13, %v765_v12  ;;  %2600 = vrcp.f32 %v1453_v55  ;;  %v1942_v12 = vsel %vm1731_vm3, %v1941_v23, %v1940_v18 }
 0x1d2   : > { %v810_v28 = vpop.xlane.xlu2 %809  ;;  %v945_v31 = vadd.f32 %v2940_v13, %v807_v19  ;;  %2602 = vpow2.f32 %v1322_v25  ;;  %v1970_v19 = vperm.slane %v3602_v43, %v2975_v63 }
 0x1d3   : > { %v946_v33 = vadd.f32 %v2940_v13, %v810_v28  ;;  %v1059_v37 = vsub.f32 0.0, %v931_v52  ;;  %2604 = vrcp.f32 %v1438_v30 }
 0x1d4   : > { %v1073_v40 = vsub.f32 0.0, %v945_v31  ;;  %2606 = vpow2.f32 %v1294_v0  ;;  %v1969_v31 = vsel %vm1723_vm1, %v1968_v58, %v1967_v2  ;;  %vm3762_vm1 = vmmov %vm3760_vm0 }
 0x1d5   : > { %v1074_v38 = vsub.f32 0.0, %v946_v33  ;;  %v1296_v46 = vmul.f32 1.442695, %v1059_v37  ;;  %v1945_v33 = vperm.slane %v3613_v15, %v3007_v34  ;;  %v1972_v37 = vperm.slane %v3609_v4, %v2984_v7 }
 0x1d6   : > { %v1324_v56 = vmul.f32 1.442695, %v1073_v40  ;;  %v2599_v50 = vpop.eup %2598  ;;  %v1944_v40 = vsel %vm1735_vm4, %v1943_v60, %v1942_v12  ;;  %v1974_v15 = vperm.slane %v3611_v51, %v2978_v1  ;;  %v1949_v51 = vperm.slane %v3618_v29, %v3013_v44 }
 0x1d7   : > { %v1326_v22 = vmul.f32 1.442695, %v1074_v38  ;;  %2608 = vpow2.f32 %v1296_v46  ;;  %v3639_v9 = vpop.eup %2600  ;;  %v1441_v25 = vadd.f32 1.0, %v2599_v50  ;;  %v1971_v46 = vsel %vm1727_vm2, %v1970_v19, %v1969_v31  ;;  %vm3763_vm2 = vmmov %vm3761_vm11 }
 0x1d8   : > { %v813_v61 = vpop.xlane.xlu1 %812  ;;  %2610 = vpow2.f32 %v1324_v56  ;;  %v2603_v10 = vpop.eup %2602  ;;  %v1946_v18 = vsel %vm1739_vm5, %v1945_v33, %v1944_v40  ;;  %v1978_v19 = vperm.slane %v3630_v59, %v3018_v47 }
 0x1d9   : > { %v768_v3 = vpop.xlane.xlu0 %767  ;;  %v947_v32 = vadd.f32 %v2940_v13, %v813_v61  ;;  %2612 = vrcp.f32 %v1439_v49  ;;  %v3646_v54 = vpop.eup %2604  ;;  %v1456_v0 = vadd.f32 1.0, %v2603_v10 }
 0x1da   : > { %v771_v6 = vpop.xlane.xlu2 %770  ;;  %v932_v55 = vadd.f32 %v2940_v13, %v768_v3  ;;  %2614 = vpow2.f32 %v1326_v22  ;;  %v2607_v30 = vpop.eup %2606  ;;  %v1947_v22 = vperm.slane %v3615_v24, %v3018_v47  ;;  %v1973_v24 = vsel %vm1731_vm3, %v1972_v37, %v1971_v46 }
 0x1db   : > { %v933_v41 = vadd.f32 %v2940_v13, %v771_v6  ;;  %v1075_v21 = vsub.f32 0.0, %v947_v32  ;;  %2616 = vrcp.f32 %v1440_v26  ;;  %v1442_v48 = vadd.f32 1.0, %v2607_v30 }
 0x1dc   : > { %v1060_v52 = vsub.f32 0.0, %v932_v55  ;;  %2618 = vrcp.f32 %v1454_v8  ;;  %v1976_v26 = vperm.slane %v3624_v39, %v3007_v34  ;;  %v1975_v29 = vsel %vm1735_vm4, %v1974_v15, %v1973_v24  ;;  %vm3764_vm4 = vmmov %vm3760_vm0 }
 0x1dd   : > { %v1061_v28 = vsub.f32 0.0, %v933_v41  ;;  %v1328_v35 = vmul.f32 1.442695, %v1075_v21  ;;  %v2609_v36 = vpop.eup %2608  ;;  %2620 = vrcp.f32 %v1455_v14  ;;  %v1948_v34 = vsel %vm1743_vm6, %v1947_v22, %v1946_v18 }
 0x1de   : > { %v1298_v63 = vmul.f32 1.442695, %v1060_v52  ;;  %v2611_v43 = vpop.eup %2610  ;;  %v1443_v23 = vadd.f32 1.0, %v2609_v36  ;;  %v1950_v55 = vsel %vm1747_vm7, %v1949_v51, %v1948_v34  ;;  %v1977_v41 = vsel %vm1739_vm5, %v1976_v26, %v1975_v29  ;;  %vm3765_vm5 = vmmov %vm3763_vm2 }
 0x1df   : > { %2622 = vpow2.f32 %v1328_v35  ;;  %v1300_v38 = vmul.f32 1.442695, %v1061_v28  ;;  %v2613_v45 = vpop.eup %2612  ;;  %v1457_v60 = vadd.f32 1.0, %v2611_v43  ;;  %v1980_v52 = vperm.slane %v3639_v9, %v3013_v44 }
 0x1e0   : > { %2624 = vrcp.f32 %v1441_v25  ;;  %v819_v56 = vpop.xlane.xlu1 %818  ;;  %v2615_v57 = vpop.eup %2614  ;;  %v1953_v21 = vperm.slane %v2613_v45, %v3041_v17  ;;  %vm2008_vm3 = vcmask 1046534  }
 0x1e1   : > { %v816_v49 = vpop.xlane.xlu0 %815  ;;  %2626 = vpow2.f32 %v1298_v63  ;;  %v2617_v4 = vpop.eup %2616  ;;  %v949_v2 = vadd.f32 %v2940_v13, %v819_v56  ;;  %v1458_v50 = vadd.f32 1.0, %v2615_v57 }
 0x1e2   : > { %v948_v7 = vadd.f32 %v2940_v13, %v816_v49  ;;  %2628 = vrcp.f32 %v1456_v0  ;;  %v2619_v1 = vpop.eup %2618  ;;  %v1951_v13 = vperm.slane %v3646_v54, %v3032_v5  ;;  %v1955_v30 = vperm.slane %v2617_v4, %v3038_v16 }
 0x1e3   : > { %2630 = vpow2.f32 %v1300_v38  ;;  %v3666_v3 = vpop.eup %2620  ;;  %v1077_v58 = vsub.f32 0.0, %v949_v2  ;;  %v1982_v47 = vperm.slane %v2619_v1, %v3032_v5  ;;  %v1979_v0 = vsel %vm1743_vm6, %v1978_v19, %v1977_v41 }
 0x1e4   : > { %v1076_v61 = vsub.f32 0.0, %v948_v7  ;;  %2632 = vrcp.f32 %v1442_v48  ;;  %v1952_v28 = vsel %vm1751_vm8, %v1951_v13, %v1950_v55  ;;  %v1981_v63 = vsel %vm1747_vm7, %v1980_v52, %v1979_v0 }
 0x1e5   : > { %v2623_v8 = vpop.eup %2622  ;;  %2634 = vrcp.f32 %v1443_v23  ;;  %v1332_v39 = vmul.f32 1.442695, %v1077_v58  ;;  %v1954_v44 = vsel %vm1755_vm9, %v1953_v21, %v1952_v28  ;;  %v1984_v38 = vperm.slane %v3666_v3, %v3041_v17 }
 0x1e6   : > { %v1330_v32 = vmul.f32 1.442695, %v1076_v61  ;;  %v2625_v6 = vpop.eup %2624  ;;  %2636 = vrcp.f32 %v1457_v60  ;;  %v1459_v10 = vadd.f32 1.0, %v2623_v8  ;;  %v1956_v43 = vsel %vm1759_vm10, %v1955_v30, %v1954_v44 }
 0x1e7   : > { %v2627_v14 = vpop.eup %2626  ;;  %v1957_v33 = vperm.slane %v2625_v6, %v3048_v20  ;;  %v1983_v48 = vsel %vm1751_vm8, %v1982_v47, %v1981_v63  ;;  %vm2010_vm6 = vcmask 1047559  }
 0x1e8   : > { %2638 = vpow2.f32 %v1330_v32  ;;  %v2629_v12 = vpop.eup %2628  ;;  %v1444_v54 = vadd.f32 1.0, %v2627_v14  ;;  %v1985_v22 = vsel %vm1755_vm9, %v1984_v38, %v1983_v48 }
 0x1e9   : > { %2640 = vrcp.f32 %v1458_v50  ;;  %v2631_v25 = vpop.eup %2630  ;;  %v1958_v5 = vsel %vm3762_vm1, %v1957_v33, %v1956_v43  ;;  %v1986_v49 = vperm.slane %v2629_v12, %v3038_v16 }
 0x1ea   : > { %2642 = vpow2.f32 %v1332_v39  ;;  %v2633_v31 = vpop.eup %2632  ;;  %v1445_v35 = vadd.f32 1.0, %v2631_v25 }
 0x1eb   : > { %2644 = vrcp.f32 %v1444_v54  ;;  %v2635_v36 = vpop.eup %2634  ;;  %v1959_v37 = vperm.slane %v2633_v31, %v3076_v62  ;;  %v1987_v60 = vsel %vm1759_vm10, %v1986_v49, %v1985_v22 }
 0x1ec   : > { %2646 = vrcp.f32 %v1459_v10  ;;  %v2637_v59 = vpop.eup %2636  ;;  %v1961_v45 = vperm.slane %v2635_v36, %v3057_v27 }
 0x1ed   : > { %2648 = vrcp.f32 %v1445_v35  ;;  %v1988_v57 = vperm.slane %v2637_v59, %v3048_v20  ;;  %v1960_v7 = vsel %vm3763_vm2, %v1959_v37, %v1958_v5 }
 0x1ee   : > { %v2639_v9 = vpop.eup %2638  ;;  %v1962_v16 = vsel %vm1771_vm13, %v1961_v45, %v1960_v7 }
 0x1ef   : > { %v2641_v40 = vpop.eup %2640  ;;  %v1460_v46 = vadd.f32 1.0, %v2639_v9  ;;  %v1989_v26 = vsel %vm3764_vm4, %v1988_v57, %v1987_v60 }
 0x1f0   : > { %v2643_v15 = vpop.eup %2642  ;;  %v1990_v20 = vperm.slane %v2641_v40, %v3076_v62 }
 0x1f1   : > { %v2645_v56 = vpop.eup %2644  ;;  %2650 = vrcp.f32 %v1460_v46  ;;  %v1461_v18 = vadd.f32 1.0, %v2643_v15 }
 0x1f2   : > { %v2647_v23 = vpop.eup %2646  ;;  %v1963_v17 = vperm.slane %v2645_v56, %v3099_v53  ;;  %v1991_v58 = vsel %vm3765_vm5, %v1990_v20, %v1989_v26 }
 0x1f3   : > { %v2649_v4 = vpop.eup %2648  ;;  %2652 = vrcp.f32 %v1461_v18  ;;  %v1992_v51 = vperm.slane %v2647_v23, %v3057_v27 }
 0x1f4   : > { %v1965_v2 = vperm.slane %v2649_v4, %v3142_v11  ;;  %v1964_v1 = vsel %vm1775_vm14, %v1963_v17, %v1962_v16 }
 0x1f5   : > { %v1993_v24 = vsel %vm1771_vm13, %v1992_v51, %v1991_v58 }
 0x1f6   : > { %v1966_v61 = vsel %vm1779_vm15, %v1965_v2, %v1964_v1 }
 0x1f7   : > { %v2651_v3 = vpop.eup %2650  ;;  %v2009_v50 = vsel %vm2008_vm3, %v1966_v61, %v3572_v42 }
 0x1f8   : > { %v1994_v62 = vperm.slane %v2651_v3, %v3099_v53 }
 0x1f9   : > { %v2653_v8 = vpop.eup %2652 }
 0x1fa   : > { %v1995_v27 = vsel %vm1775_vm14, %v1994_v62, %v1993_v24  ;;  %v1996_v13 = vperm.slane %v2653_v8, %v3142_v11 }
 0x1fc   : > { %v1997_v32 = vsel %vm1779_vm15, %v1996_v13, %v1995_v27 }
 0x1fd   : > { %v2011_v42 = vsel %vm2010_vm6, %v1997_v32, %v2009_v50 }
 0x1fe   : > { %2013 = vst [vmem:[%s167_s20] sm:$0xff] %v2011_v42 }
 0x1ff   : > { %2683 = shalt.err (!%p2680_p3)
}
 0x200   : > { %2102 = dma.vmem_to_hbm [thread:$0]  (%p2778_p5), %s2028_s21, 128, %s2030_s26, %s2015_s25  }
 0x201 PF: > { %p2108_p4 = scmp.ge.s32.totalorder %s2718_s17, 2  ;;  %s2041_s7 = sand.u32 1, %s2706_s14  }
 0x202   : > { %s2042_s8 = scalar_lea.sflag [#allocation4], %s2041_s7 }
 0x203   : > { %p2105_p7 = pnand %p2108_p4, %p2782_p6 }
 0x205   : > { %p2106_p8 = pneg %p2105_p7 }
 0x207   : > { %2701 = dma.done.wait (%p2106_p8), %s2042_s8, 128  }
 0x208   : > { %2703 = vsyncadd (%p2106_p8), %s2042_s8, 4294967168  ;;  %p14_p9 = scmp.ge.s32.totalorder %s2766_s19, 4   ;;  %s3766_s14 = smov %s2710_s15 }
 0x209   : > { %s3767_s15 = smov %s2714_s16  ;;  %s3768_s16 = smov %s2776_s22 }
 0x20a   : > { %s3769_s17 = smov %s2766_s19  ;;  %16 = sbr.rel (!%p14_p9) target bundleno = 5 (0x5), region = 67 }
 0x20f   :  { %2048 = vsyncpa [#allocation4], 1 }
 0x210   :  { %2050 = vsyncpa [#allocation4 + $0x1], 1 }

</bundles_post_ra>
